<compile_context>
chip_gen: v7x
topology: tpu7x:2x2x1
jax: 0.10.0
libtpu: 0.0.40
codegen_flags: <defaults>
</compile_context>

<pallas_src>
import jax
import jax.numpy as jnp
from jax.experimental import pallas as pl
from jax.experimental.pallas import tpu as pltpu


# ----------------------------- Pallas kernels --------------------------------

def _matmul_bias_relu_kernel(x_ref, w_ref, b_ref, o_ref):
    # bf16 x / w feed the MXU at full rate; accumulate + bias + ReLU in f32,
    # store narrow bf16 output (only the real Cout lanes hit HBM).
    y = jnp.dot(x_ref[...], w_ref[...], preferred_element_type=jnp.float32)
    o_ref[...] = jnp.maximum(y + b_ref[...], 0.0).astype(o_ref.dtype)


def _fc_critic_kernel(x_ref, wf_ref, bf_ref, wc_ref, bc_ref, feat_ref, val_ref):
    h = jnp.dot(x_ref[...], wf_ref[...], preferred_element_type=jnp.float32)
    h = jnp.maximum(h + bf_ref[...], 0.0)
    feat_ref[...] = h
    # Critic head fused: N=1 output -> VPU multiply + lane reduction instead of
    # a second MXU matmul with a single (masked) output column.
    val_ref[...] = jnp.sum(h * wc_ref[...], axis=-1, keepdims=True) + bc_ref[...]


# --------------------------- row-tiling helpers -------------------------------

def _pick_tm(M, target):
    """Row-tile choice: multiple of 16 (bf16 sublane packing), <= target,
    prefers an exact divisor of M, and leaves >= 2 grid steps when M allows
    (v7x has 2 TensorCores).  Caller pads M up when no divisor exists."""
    if M <= 16:
        return M                                   # tiny: one full-dim block
    cap = max(16, min(target, (M // 2) // 16 * 16))
    for tm in range(cap, 15, -16):                 # prefer an exact divisor
        if M % tm == 0:
            return tm
    return cap                                     # ragged: pad M to k * cap


def _pad_rows(x, tm):
    M = x.shape[0]
    Mp = pl.cdiv(M, tm) * tm
    if Mp == M:
        return x
    pad = [(0, Mp - M)] + [(0, 0)] * (x.ndim - 1)
    return jnp.pad(x, pad)


def matmul_bias_relu(x, w, b_row, *, tm_target=1024, out_dtype=jnp.bfloat16):
    """relu(x @ w + b): M-tiled 'parallel' grid, weight resident, narrow output."""
    M0, K = x.shape
    K2, N = w.shape
    assert K == K2, (K, K2)
    tm = _pick_tm(M0, tm_target)
    x = _pad_rows(x, tm)
    M = x.shape[0]
    out = pl.pallas_call(
        _matmul_bias_relu_kernel,
        out_shape=jax.ShapeDtypeStruct((M, N), out_dtype),
        grid=(M // tm,),
        in_specs=[
            pl.BlockSpec((tm, K), lambda i: (i, 0)),
            pl.BlockSpec((K, N), lambda i: (0, 0)),
            pl.BlockSpec((1, N), lambda i: (0, 0)),
        ],
        out_specs=pl.BlockSpec((tm, N), lambda i: (i, 0)),
        compiler_params=pltpu.CompilerParams(
            dimension_semantics=("parallel",)),
    )(x, w, b_row)
    return out if M == M0 else out[:M0]


def fc_critic(x, w_fc, b_fc_row, w_critic_row, b_critic, *, tm_target=512):
    """Fused fc(+ReLU) and critic head, tiled over M with the fc weight resident."""
    M0, K = x.shape
    K2, H = w_fc.shape
    assert K == K2, (K, K2)
    tm = _pick_tm(M0, tm_target)
    x = _pad_rows(x, tm)
    M = x.shape[0]
    feat, val = pl.pallas_call(
        _fc_critic_kernel,
        out_shape=(jax.ShapeDtypeStruct((M, H), jnp.float32),
                   jax.ShapeDtypeStruct((M, 1), jnp.float32)),
        grid=(M // tm,),
        in_specs=[
            pl.BlockSpec((tm, K), lambda i: (i, 0)),
            pl.BlockSpec((K, H), lambda i: (0, 0)),
            pl.BlockSpec((1, H), lambda i: (0, 0)),
            pl.BlockSpec((1, H), lambda i: (0, 0)),
            pl.BlockSpec((1, 1), lambda i: (0, 0)),
        ],
        out_specs=(pl.BlockSpec((tm, H), lambda i: (i, 0)),
                   pl.BlockSpec((tm, 1), lambda i: (i, 0))),
        compiler_params=pltpu.CompilerParams(
            dimension_semantics=("parallel",)),
    )(x, w_fc, b_fc_row, w_critic_row, b_critic)
    if M != M0:
        feat, val = feat[:M0], val[:M0]
    return feat, val


# ------------------------------ conv glue ------------------------------------

def _tf_same_pad(x_nhwc, k, s):
    """Padding identical to Conv2d_tf 'SAME' (extra pad on bottom/right)."""
    def _pads(size):
        out = -(-size // s)
        total = max(0, (out - 1) * s + k - size)
        return (total // 2, total - total // 2)
    ph = _pads(x_nhwc.shape[1])
    pw = _pads(x_nhwc.shape[2])
    return jnp.pad(x_nhwc, ((0, 0), ph, pw, (0, 0)))


def _im2col(xp, k, s):
    """(N,Hp,Wp,C) -> (N*Ho*Wo, k*k*C) with patch feature layout [kh, kw, cin]."""
    n, hp, wp, c = xp.shape
    ho = (hp - k) // s + 1
    wo = (wp - k) // s + 1
    cols = []
    for kh in range(k):
        for kw in range(k):
            cols.append(xp[:, kh:kh + s * ho:s, kw:kw + s * wo:s, :])
    patches = jnp.stack(cols, axis=3)                       # (N, Ho, Wo, k*k, C)
    return patches.reshape(n * ho * wo, k * k * c), (n, ho, wo)


# --------------------------- parameter synthesis ------------------------------

def _xavier_uniform(key, shape):                             # (Cout, Cin, kh, kw)
    fan_out = shape[0] * shape[2] * shape[3]
    fan_in = shape[1] * shape[2] * shape[3]
    limit = (6.0 / (fan_in + fan_out)) ** 0.5
    return jax.random.uniform(key, shape, jnp.float32, -limit, limit)


def _orthogonal(key, shape, gain=1.0):                       # torch Linear layout (out, in)
    rows, cols = shape
    n = max(rows, cols)
    a = jax.random.normal(key, (n, n), jnp.float32)
    q, r = jnp.linalg.qr(a)
    d = jnp.diag(r)
    q = q * jnp.where(d == 0, 1.0, jnp.sign(d))[None, :]
    return (gain * q[:rows, :cols]).astype(jnp.float32)


def init_params(key, hidden_size=256):
    """Parameters in the torch module's native layouts (used by the reference)."""
    k1, k2, k3, k4 = jax.random.split(key, 4)
    return {
        "conv1_w": _xavier_uniform(k1, (16, 3, 8, 8)),       # Conv2d_tf(3, 16, 8, stride=4)
        "conv1_b": jnp.zeros((16,), jnp.float32),
        "conv2_w": _xavier_uniform(k2, (32, 16, 4, 4)),      # Conv2d_tf(16, 32, 4, stride=2)
        "conv2_b": jnp.zeros((32,), jnp.float32),
        "fc_w": _orthogonal(k3, (hidden_size, 2048), gain=2.0 ** 0.5),
        "fc_b": jnp.zeros((hidden_size,), jnp.float32),
        "critic_w": _orthogonal(k4, (1, hidden_size)),
        "critic_b": jnp.zeros((1,), jnp.float32),
    }


def prepare_params(p, hidden_size=256):
    """One-time layout prep: transpose / permute / cast to bf16 outside hot path."""
    cout1, cout2 = 16, 32
    # conv1: (16,3,8,8) -> (kh*kw*cin, cout) = (192, 16), bf16.
    w1 = jnp.transpose(p["conv1_w"], (2, 3, 1, 0)).reshape(8 * 8 * 3, cout1)
    w1 = w1.astype(jnp.bfloat16)
    b1 = p["conv1_b"].reshape(1, cout1).astype(jnp.float32)
    # conv2: (32,16,4,4) -> (256, 32), bf16.
    w2 = jnp.transpose(p["conv2_w"], (2, 3, 1, 0)).reshape(4 * 4 * 16, cout2)
    w2 = w2.astype(jnp.bfloat16)
    b2 = p["conv2_b"].reshape(1, cout2).astype(jnp.float32)
    # fc: permute input dim from PyTorch's (C,H,W) flatten order to the NHWC
    # (H,W,C) order produced by the conv2 kernel, then pre-transpose to (in,out).
    wf = p["fc_w"].reshape(hidden_size, cout2, 8, 8)
    wf = jnp.transpose(wf, (0, 2, 3, 1)).reshape(hidden_size, 8 * 8 * cout2)
    wf = jnp.transpose(wf, (1, 0)).astype(jnp.bfloat16)                 # (2048, 256)
    bf = p["fc_b"].reshape(1, hidden_size).astype(jnp.float32)
    wc = p["critic_w"].reshape(1, hidden_size).astype(jnp.float32)
    bc = p["critic_b"].reshape(1, 1).astype(jnp.float32)
    return {"w1": w1, "b1": b1, "w2": w2, "b2": b2,
            "wf": wf, "bf": bf, "wc": wc, "bc": bc}


# ------------------------------- forward --------------------------------------

def small_net_forward(prep, inputs_nchw, rnn_hxs, masks):
    # SmallNetBase default: recurrent=False, so rnn_hxs/masks pass through untouched.
    # Single transpose+cast pass; bf16 from here on so all glue copies are half-width.
    x = jnp.transpose(inputs_nchw, (0, 2, 3, 1)).astype(jnp.bfloat16)   # NHWC bf16

    # conv1: 8x8 / stride 4, TF-SAME, im2col GEMM, fused bias+ReLU, (M,16) bf16 out.
    xp = _tf_same_pad(x, 8, 4)
    patches, (n, ho, wo) = _im2col(xp, 8, 4)                  # (N*16*16, 192) bf16
    y = matmul_bias_relu(patches, prep["w1"], prep["b1"], tm_target=1024)
    y = y.reshape(n, ho, wo, 16)                              # NHWC bf16

    # conv2: 4x4 / stride 2, TF-SAME, im2col GEMM, fused bias+ReLU, (M,32) bf16 out.
    xp = _tf_same_pad(y, 4, 2)
    patches, (n, ho, wo) = _im2col(xp, 4, 2)                  # (N*8*8, 256) bf16
    y = matmul_bias_relu(patches, prep["w2"], prep["b2"], tm_target=1024)

    # (N*64, 32) -> (N, 2048): free contiguous view, NHWC flatten order
    # (fc weight was permuted at init to match PyTorch's (C,H,W) flatten).
    flat = y.reshape(n, ho * wo * 32)

    # fc + critic fused into one M-tiled kernel (fc weight resident per tile).
    feat, value = fc_critic(flat, prep["wf"], prep["bf"], prep["wc"], prep["bc"])
    return value, feat, rnn_hxs


# --------------------------------- main ----------------------------------------

if __name__ == "__main__":
    key = jax.random.PRNGKey(0)
    pkey, xkey = jax.random.split(key)
    params = init_params(pkey)
    prep = prepare_params(params)

    batch = 2
    # 64x64x3 input is what yields the module's hard-coded fc input of 2048 (= 32*8*8).
    inputs = jax.random.normal(xkey, (batch, 3, 64, 64), jnp.float32)
    rnn_hxs = jnp.zeros((batch, 1), jnp.float32)
    masks = jnp.ones((batch, 1), jnp.float32)

    value, feat, hxs_out = jax.jit(small_net_forward)(prep, inputs, rnn_hxs, masks)
    jax.block_until_ready((value, feat, hxs_out))

    # Cross-check against a pure-XLA reference of the same math (torch layouts),
    # with bf16 operands / f32 accumulation at the same points as the kernels.
    def ref_forward(params, x_nchw):
        bf16, f32 = jnp.bfloat16, jnp.float32

        def conv_tf_same(x, w, b, s):
            y = jax.lax.conv_general_dilated(
                x.astype(bf16), w.astype(bf16), (s, s), "SAME",
                dimension_numbers=("NCHW", "OIHW", "NCHW"),
                preferred_element_type=f32)
            return jax.nn.relu(y + b[None, :, None, None])

        x = conv_tf_same(x_nchw, params["conv1_w"], params["conv1_b"], 4)
        x = conv_tf_same(x, params["conv2_w"], params["conv2_b"], 2)
        x = x.reshape(x.shape[0], -1)                         # (C,H,W) flatten
        h = jnp.dot(x.astype(bf16), params["fc_w"].T.astype(bf16),
                    preferred_element_type=f32)
        h = jax.nn.relu(h + params["fc_b"])
        v = h @ params["critic_w"].T + params["critic_b"]
        return v, h

    v_ref, f_ref = ref_forward(params, inputs)
    assert value.shape == (batch, 1) and feat.shape == (batch, 256)
    assert hxs_out.shape == rnn_hxs.shape
    assert jnp.allclose(value, v_ref, atol=1e-2, rtol=1e-2)
    assert jnp.allclose(feat, f_ref, atol=1e-2, rtol=1e-2)

    print("KERNEL_OK")
</pallas_src>

<mosaic_0001>
module attributes {stable_mosaic.version = 11 : i64} {
  func.func @_matmul_bias_relu_kernel(%arg0: i32, %arg1: memref<256x192xbf16, #tpu.memory_space<vmem>>, %arg2: memref<192x16xbf16, #tpu.memory_space<vmem>>, %arg3: memref<1x16xf32, #tpu.memory_space<vmem>>, %arg4: memref<256x16xbf16, #tpu.memory_space<vmem>>) attributes {dimension_semantics = [#tpu.dimension_semantics<parallel>], iteration_bounds = array<i64: 2>, scalar_prefetch = 0 : i64, scratch_operands = 0 : i64, tpu.core_type = #tpu.core_type<tc>, window_params = [{transform_indices = @transform_0, window_bounds = array<i64: 256, 192>}, {pipeline_mode = #tpu.pipeline_mode<synchronous>, transform_indices = @transform_1, window_bounds = array<i64: 192, 16>}, {pipeline_mode = #tpu.pipeline_mode<synchronous>, transform_indices = @transform_2, window_bounds = array<i64: 1, 16>}, {transform_indices = @transform_3, window_bounds = array<i64: 256, 16>}]} {
    %c0 = arith.constant 0 : index
    %c0_0 = arith.constant 0 : index
    %0 = vector.load %arg1[%c0, %c0_0] : memref<256x192xbf16, #tpu.memory_space<vmem>>, vector<256x192xbf16>
    %c0_1 = arith.constant 0 : index
    %c0_2 = arith.constant 0 : index
    %1 = vector.load %arg2[%c0_1, %c0_2] : memref<192x16xbf16, #tpu.memory_space<vmem>>, vector<192x16xbf16>
    %cst = arith.constant dense<0.000000e+00> : vector<256x16xf32>
    %2 = tpu.matmul %0, %1, %cst {dimension_numbers = #tpu.dot_dimension_numbers<[1], [0], [0], [1], [0, 0, 1, 1], [], []>} : vector<256x192xbf16>, vector<192x16xbf16>, vector<256x16xf32> -> vector<256x16xf32>
    %c0_3 = arith.constant 0 : index
    %c0_4 = arith.constant 0 : index
    %3 = vector.load %arg3[%c0_3, %c0_4] : memref<1x16xf32, #tpu.memory_space<vmem>>, vector<1x16xf32>
    %4 = vector.broadcast %3 : vector<1x16xf32> to vector<256x16xf32>
    %5 = arith.addf %2, %4 : vector<256x16xf32>
    %cst_5 = arith.constant 0.000000e+00 : f32
    %6 = vector.broadcast %cst_5 : f32 to vector<256x16xf32>
    %7 = arith.maximumf %5, %6 : vector<256x16xf32>
    %8 = arith.truncf %7 : vector<256x16xf32> to vector<256x16xbf16>
    %c0_6 = arith.constant 0 : index
    %c0_7 = arith.constant 0 : index
    %9 = vector.load %arg4[%c0_6, %c0_7] : memref<256x16xbf16, #tpu.memory_space<vmem>>, vector<256x16xbf16>
    tpu.vector_store %arg4[%c0_6, %c0_7], %8 {strides = array<i32>} : memref<256x16xbf16, #tpu.memory_space<vmem>>, vector<256x16xbf16>,
    return
  }
  func.func @transform_0(%arg0: i32) -> (i32, i32) {
    %c0_i32 = arith.constant 0 : i32
    %c0_i32_0 = arith.constant 0 : i32
    return %arg0, %c0_i32 : i32, i32
  }
  func.func @transform_1(%arg0: i32) -> (i32, i32) {
    %c0_i32 = arith.constant 0 : i32
    %c0_i32_0 = arith.constant 0 : i32
    %c0_i32_1 = arith.constant 0 : i32
    return %c0_i32, %c0_i32_0 : i32, i32
  }
  func.func @transform_2(%arg0: i32) -> (i32, i32) {
    %c0_i32 = arith.constant 0 : i32
    %c0_i32_0 = arith.constant 0 : i32
    %c0_i32_1 = arith.constant 0 : i32
    return %c0_i32, %c0_i32_0 : i32, i32
  }
  func.func @transform_3(%arg0: i32) -> (i32, i32) {
    %c0_i32 = arith.constant 0 : i32
    %c0_i32_0 = arith.constant 0 : i32
    return %arg0, %c0_i32 : i32, i32
  }
}

module attributes {stable_mosaic.version = 11 : i64} {
  func.func @_matmul_bias_relu_kernel(%arg0: i32, %arg1: memref<64x256xbf16, #tpu.memory_space<vmem>>, %arg2: memref<256x32xbf16, #tpu.memory_space<vmem>>, %arg3: memref<1x32xf32, #tpu.memory_space<vmem>>, %arg4: memref<64x32xbf16, #tpu.memory_space<vmem>>) attributes {dimension_semantics = [#tpu.dimension_semantics<parallel>], iteration_bounds = array<i64: 2>, scalar_prefetch = 0 : i64, scratch_operands = 0 : i64, tpu.core_type = #tpu.core_type<tc>, window_params = [{transform_indices = @transform_0, window_bounds = array<i64: 64, 256>}, {pipeline_mode = #tpu.pipeline_mode<synchronous>, transform_indices = @transform_1, window_bounds = array<i64: 256, 32>}, {pipeline_mode = #tpu.pipeline_mode<synchronous>, transform_indices = @transform_2, window_bounds = array<i64: 1, 32>}, {transform_indices = @transform_3, window_bounds = array<i64: 64, 32>}]} {
    %c0 = arith.constant 0 : index
    %c0_0 = arith.constant 0 : index
    %0 = vector.load %arg1[%c0, %c0_0] : memref<64x256xbf16, #tpu.memory_space<vmem>>, vector<64x256xbf16>
    %c0_1 = arith.constant 0 : index
    %c0_2 = arith.constant 0 : index
    %1 = vector.load %arg2[%c0_1, %c0_2] : memref<256x32xbf16, #tpu.memory_space<vmem>>, vector<256x32xbf16>
    %cst = arith.constant dense<0.000000e+00> : vector<64x32xf32>
    %2 = tpu.matmul %0, %1, %cst {dimension_numbers = #tpu.dot_dimension_numbers<[1], [0], [0], [1], [0, 0, 1, 1], [], []>} : vector<64x256xbf16>, vector<256x32xbf16>, vector<64x32xf32> -> vector<64x32xf32>
    %c0_3 = arith.constant 0 : index
    %c0_4 = arith.constant 0 : index
    %3 = vector.load %arg3[%c0_3, %c0_4] : memref<1x32xf32, #tpu.memory_space<vmem>>, vector<1x32xf32>
    %4 = vector.broadcast %3 : vector<1x32xf32> to vector<64x32xf32>
    %5 = arith.addf %2, %4 : vector<64x32xf32>
    %cst_5 = arith.constant 0.000000e+00 : f32
    %6 = vector.broadcast %cst_5 : f32 to vector<64x32xf32>
    %7 = arith.maximumf %5, %6 : vector<64x32xf32>
    %8 = arith.truncf %7 : vector<64x32xf32> to vector<64x32xbf16>
    %c0_6 = arith.constant 0 : index
    %c0_7 = arith.constant 0 : index
    %9 = vector.load %arg4[%c0_6, %c0_7] : memref<64x32xbf16, #tpu.memory_space<vmem>>, vector<64x32xbf16>
    tpu.vector_store %arg4[%c0_6, %c0_7], %8 {strides = array<i32>} : memref<64x32xbf16, #tpu.memory_space<vmem>>, vector<64x32xbf16>,
    return
  }
  func.func @transform_0(%arg0: i32) -> (i32, i32) {
    %c0_i32 = arith.constant 0 : i32
    %c0_i32_0 = arith.constant 0 : i32
    return %arg0, %c0_i32 : i32, i32
  }
  func.func @transform_1(%arg0: i32) -> (i32, i32) {
    %c0_i32 = arith.constant 0 : i32
    %c0_i32_0 = arith.constant 0 : i32
    %c0_i32_1 = arith.constant 0 : i32
    return %c0_i32, %c0_i32_0 : i32, i32
  }
  func.func @transform_2(%arg0: i32) -> (i32, i32) {
    %c0_i32 = arith.constant 0 : i32
    %c0_i32_0 = arith.constant 0 : i32
    %c0_i32_1 = arith.constant 0 : i32
    return %c0_i32, %c0_i32_0 : i32, i32
  }
  func.func @transform_3(%arg0: i32) -> (i32, i32) {
    %c0_i32 = arith.constant 0 : i32
    %c0_i32_0 = arith.constant 0 : i32
    return %arg0, %c0_i32 : i32, i32
  }
}

module attributes {stable_mosaic.version = 11 : i64} {
  func.func @_fc_critic_kernel(%arg0: i32, %arg1: memref<2x2048xbf16, #tpu.memory_space<vmem>>, %arg2: memref<2048x256xbf16, #tpu.memory_space<vmem>>, %arg3: memref<1x256xf32, #tpu.memory_space<vmem>>, %arg4: memref<1x256xf32, #tpu.memory_space<vmem>>, %arg5: memref<1x1xf32, #tpu.memory_space<vmem>>, %arg6: memref<2x256xf32, #tpu.memory_space<vmem>>, %arg7: memref<2x1xf32, #tpu.memory_space<vmem>>) attributes {dimension_semantics = [#tpu.dimension_semantics<parallel>], iteration_bounds = array<i64: 1>, scalar_prefetch = 0 : i64, scratch_operands = 0 : i64, tpu.core_type = #tpu.core_type<tc>, window_params = [{transform_indices = @transform_0, window_bounds = array<i64: 2, 2048>}, {pipeline_mode = #tpu.pipeline_mode<synchronous>, transform_indices = @transform_1, window_bounds = array<i64: 2048, 256>}, {pipeline_mode = #tpu.pipeline_mode<synchronous>, transform_indices = @transform_2, window_bounds = array<i64: 1, 256>}, {pipeline_mode = #tpu.pipeline_mode<synchronous>, transform_indices = @transform_3, window_bounds = array<i64: 1, 256>}, {pipeline_mode = #tpu.pipeline_mode<synchronous>, transform_indices = @transform_4, window_bounds = array<i64: 1, 1>}, {transform_indices = @transform_5, window_bounds = array<i64: 2, 256>}, {transform_indices = @transform_6, window_bounds = array<i64: 2, 1>}]} {
    %c0 = arith.constant 0 : index
    %c0_0 = arith.constant 0 : index
    %0 = vector.load %arg1[%c0, %c0_0] : memref<2x2048xbf16, #tpu.memory_space<vmem>>, vector<2x2048xbf16>
    %c0_1 = arith.constant 0 : index
    %c0_2 = arith.constant 0 : index
    %1 = vector.load %arg2[%c0_1, %c0_2] : memref<2048x256xbf16, #tpu.memory_space<vmem>>, vector<2048x256xbf16>
    %cst = arith.constant dense<0.000000e+00> : vector<2x256xf32>
    %2 = tpu.matmul %0, %1, %cst {dimension_numbers = #tpu.dot_dimension_numbers<[1], [0], [0], [1], [0, 0, 1, 1], [], []>} : vector<2x2048xbf16>, vector<2048x256xbf16>, vector<2x256xf32> -> vector<2x256xf32>
    %c0_3 = arith.constant 0 : index
    %c0_4 = arith.constant 0 : index
    %3 = vector.load %arg3[%c0_3, %c0_4] : memref<1x256xf32, #tpu.memory_space<vmem>>, vector<1x256xf32>
    %4 = vector.broadcast %3 : vector<1x256xf32> to vector<2x256xf32>
    %5 = arith.addf %2, %4 : vector<2x256xf32>
    %cst_5 = arith.constant 0.000000e+00 : f32
    %6 = vector.broadcast %cst_5 : f32 to vector<2x256xf32>
    %7 = arith.maximumf %5, %6 : vector<2x256xf32>
    %c0_6 = arith.constant 0 : index
    %c0_7 = arith.constant 0 : index
    %8 = vector.load %arg6[%c0_6, %c0_7] : memref<2x256xf32, #tpu.memory_space<vmem>>, vector<2x256xf32>
    tpu.vector_store %arg6[%c0_6, %c0_7], %7 {strides = array<i32>} : memref<2x256xf32, #tpu.memory_space<vmem>>, vector<2x256xf32>,
    %c0_8 = arith.constant 0 : index
    %c0_9 = arith.constant 0 : index
    %9 = vector.load %arg4[%c0_8, %c0_9] : memref<1x256xf32, #tpu.memory_space<vmem>>, vector<1x256xf32>
    %10 = vector.broadcast %9 : vector<1x256xf32> to vector<2x256xf32>
    %11 = arith.mulf %7, %10 : vector<2x256xf32>
    %cst_10 = arith.constant dense<0.000000e+00> : vector<2xf32>
    %12 = vector.multi_reduction <add>, %11, %cst_10 [1] : vector<2x256xf32> to vector<2xf32>
    %13 = vector.shape_cast %12 : vector<2xf32> to vector<2x1xf32>
    %c0_11 = arith.constant 0 : index
    %c0_12 = arith.constant 0 : index
    %14 = vector.load %arg5[%c0_11, %c0_12] : memref<1x1xf32, #tpu.memory_space<vmem>>, vector<1x1xf32>
    %15 = vector.broadcast %14 : vector<1x1xf32> to vector<2x1xf32>
    %16 = arith.addf %13, %15 : vector<2x1xf32>
    %c0_13 = arith.constant 0 : index
    %c0_14 = arith.constant 0 : index
    %17 = vector.load %arg7[%c0_13, %c0_14] : memref<2x1xf32, #tpu.memory_space<vmem>>, vector<2x1xf32>
    tpu.vector_store %arg7[%c0_13, %c0_14], %16 {strides = array<i32>} : memref<2x1xf32, #tpu.memory_space<vmem>>, vector<2x1xf32>,
    return
  }
  func.func @transform_0(%arg0: i32) -> (i32, i32) {
    %c0_i32 = arith.constant 0 : i32
    %c0_i32_0 = arith.constant 0 : i32
    return %arg0, %c0_i32 : i32, i32
  }
  func.func @transform_1(%arg0: i32) -> (i32, i32) {
    %c0_i32 = arith.constant 0 : i32
    %c0_i32_0 = arith.constant 0 : i32
    %c0_i32_1 = arith.constant 0 : i32
    return %c0_i32, %c0_i32_0 : i32, i32
  }
  func.func @transform_2(%arg0: i32) -> (i32, i32) {
    %c0_i32 = arith.constant 0 : i32
    %c0_i32_0 = arith.constant 0 : i32
    %c0_i32_1 = arith.constant 0 : i32
    return %c0_i32, %c0_i32_0 : i32, i32
  }
  func.func @transform_3(%arg0: i32) -> (i32, i32) {
    %c0_i32 = arith.constant 0 : i32
    %c0_i32_0 = arith.constant 0 : i32
    %c0_i32_1 = arith.constant 0 : i32
    return %c0_i32, %c0_i32_0 : i32, i32
  }
  func.func @transform_4(%arg0: i32) -> (i32, i32) {
    %c0_i32 = arith.constant 0 : i32
    %c0_i32_0 = arith.constant 0 : i32
    %c0_i32_1 = arith.constant 0 : i32
    return %c0_i32, %c0_i32_0 : i32, i32
  }
  func.func @transform_5(%arg0: i32) -> (i32, i32) {
    %c0_i32 = arith.constant 0 : i32
    %c0_i32_0 = arith.constant 0 : i32
    return %arg0, %c0_i32 : i32, i32
  }
  func.func @transform_6(%arg0: i32) -> (i32, i32) {
    %c0_i32 = arith.constant 0 : i32
    %c0_i32_0 = arith.constant 0 : i32
    return %arg0, %c0_i32 : i32, i32
  }
}

</mosaic_0001>

<bundles_post_ra>
// kernel: small_net_forward.3
= control target key start
LH: loop header
LB: loop body
LE: loop exit
PB: predicated region body
PF: predicated region fallthrough
CT: control target
= control target key end

     0   :  { %s1176_s12 = smov 0   ;;  %s1410_s0 = inlined_call_operand.vmem [shape: bf16[512,192], index: 0, kind: input, shape index: {}]   ;;  %s1411_s1 = inlined_call_operand.vmem [shape: bf16[192,16], index: 1, kind: input, shape index: {}]   ;;  %s1412_s2 = inlined_call_operand.vmem [shape: f32[1,16], index: 2, kind: input, shape index: {}]   ;;  %s1413_s3 = inlined_call_operand.vmem [shape: bf16[512,16], index: 3, kind: output, shape index: {}]  }
   0x1 LB: > { %s916_s13 = sadd.s32 4294967295, %s1153_s12   ;;  %p920_p0 = scmp.ge.s32.totalorder %s1153_s12, 1  ;;  %s1153_s12 = sphi %s1176_s12, %s13_s12  }
   0x2   : > { %p139_p1 = scmp.lt.s32.totalorder %s1153_s12, 3 }
   0x4   : > { %p140_p2 = pnand %p920_p0, %p139_p1 }
   0x5   : > { %v1087_v0 = vld [vmem:[%s1411_s1] sm:$0xff] (!%p140_p2)   ;;  %v1155_v1 = vmov (!%p140_p2), 0   ;;  %s921_s16 = sshll.u32 (!%p140_p2), %s916_s13, 5  ;;  %v1088_v2 = vld [vmem:[%s1411_s1 + $0x8] sm:$0xff] (!%p140_p2)   ;;  %v1089_v3 = vld [vmem:[%s1411_s1 + $0x10] sm:$0xff] (!%p140_p2)   ;;  %vm457_vm0 = vcmask (!%p140_p2), 523264  }
   0x6   : > { %143 = sbr.rel (%p140_p2) target bundleno = 331 (0x14b), region = 32  ;;  %506 = vmatprep.subr.bf16.mxu0 (!%p140_p2), %v1155_v1  ;;  %1054 = vmatprep.subr.bf16.mxu1 (!%p140_p2), %v1155_v1  ;;  %p165_p3 = scmp.lt.s32.totalorder (!%p140_p2), %s921_s16, 63  ;;  %v1090_v4 = vld [vmem:[%s1411_s1 + $0x18] sm:$0xff] (!%p140_p2)   ;;  %v1091_v6 = vld [vmem:[%s1411_s1 + $0x20] sm:$0xff] (!%p140_p2)   ;;  %v1092_v8 = vld [vmem:[%s1411_s1 + $0x28] sm:$0xff] (!%p140_p2)   ;;  %vm827_vm1 = vcmask (!%p140_p2), 125952  }
   0x7   : > { %507 = vmatpush1.bf16.msra.mxu0 (!%p140_p2), %v1087_v0  ;;  %1066 = vmatpush1.bf16.msra.mxu1 (!%p140_p2), %v1087_v0  ;;  %v1093_v9 = vld [vmem:[%s1411_s1 + $0x30] sm:$0xff] (!%p140_p2)   ;;  %v1094_v10 = vld [vmem:[%s1411_s1 + $0x38] sm:$0xff] (!%p140_p2)   ;;  %v1095_v11 = vld [vmem:[%s1411_s1 + $0x40] sm:$0xff] (!%p140_p2)  }
   0x8   : > { %508 = vmatprep.subr.bf16.mxu0 (!%p140_p2), %v1155_v1  ;;  %1055 = vmatprep.subr.bf16.mxu1 (!%p140_p2), %v1155_v1  ;;  %v1096_v12 = vld [vmem:[%s1411_s1 + $0x48] sm:$0xff] (!%p140_p2)   ;;  %v1097_v13 = vld [vmem:[%s1411_s1 + $0x50] sm:$0xff] (!%p140_p2)   ;;  %v1098_v14 = vld [vmem:[%s1411_s1 + $0x58] sm:$0xff] (!%p140_p2)  }
   0x9   : > { %v1303_v45 = vld [vmem:[%s1412_s2] ss:$0 sm:$0xff] (!%p140_p2) }
   0xb   : > { %509 = vmatpush1.bf16.msra.mxu0 (!%p140_p2), %v1088_v2  ;;  %1067 = vmatpush1.bf16.msra.mxu1 (!%p140_p2), %v1088_v2 }
   0xc   : > { %510 = vmatprep.subr.bf16.mxu0 (!%p140_p2), %v1155_v1  ;;  %1056 = vmatprep.subr.bf16.mxu1 (!%p140_p2), %v1155_v1 }
   0xd   : > { %s1415_s16 = smov (!%p165_p3, %s921_s16), 63 }
   0xe   : > { %s1021_s21 = sshll.u32 %s1415_s16, 3  ;;  %s925_s20 = sshll.u32 %s1415_s16, 2 }
   0xf   : > { %511 = vmatpush1.bf16.msra.mxu0 %v1089_v3  ;;  %1068 = vmatpush1.bf16.msra.mxu1 %v1089_v3  ;;  %s1208_s26 = scalar_lea.vmem %s1410_s0, %s1021_s21  ;;  %s1313_s16 = scalar_lea.vmem %s1413_s3, %s925_s20 }
  0x10   : > { %512 = vmatprep.subr.bf16.mxu0 %v1155_v1  ;;  %1057 = vmatprep.subr.bf16.mxu1 %v1155_v1  ;;  %v1101_v5 = vld [vmem:[%s1208_s26 + $0x4] ss:$8 sps:$4 sm:$0xff]   ;;  %v1099_v15 = vld [vmem:[%s1208_s26] ss:$8 sps:$4 sm:$0xff]   ;;  %v1105_v17 = vld [vmem:[%s1208_s26 + $0x14] ss:$8 sps:$4 sm:$0xff]  }
  0x11   : > { %v1104_v7 = vld [vmem:[%s1208_s26 + $0x84] ss:$8 sps:$4 sm:$0xff]   ;;  %971 = vmatprep.mubr.msk.bf16.mxu0 %vm457_vm0, %v1101_v5  ;;  %v1102_v16 = vld [vmem:[%s1208_s26 + $0x80] ss:$8 sps:$4 sm:$0xff]   ;;  %v1107_v18 = vld [vmem:[%s1208_s26 + $0x94] ss:$8 sps:$4 sm:$0xff]  }
  0x12   : > { %979 = vmatprep.mubr.msk.bf16.mxu1 %vm457_vm0, %v1104_v7  ;;  %v1109_v19 = vld [vmem:[%s1208_s26 + $0x10] ss:$8 sps:$4 sm:$0xff]   ;;  %v1111_v21 = vld [vmem:[%s1208_s26 + $0x24] ss:$8 sps:$4 sm:$0xff]   ;;  %v1115_v23 = vld [vmem:[%s1208_s26 + $0x20] ss:$8 sps:$4 sm:$0xff]  }
  0x13   : > { %513 = vmatpush1.bf16.msra.mxu0 %v1090_v4  ;;  %1069 = vmatpush1.bf16.msra.mxu1 %v1090_v4  ;;  %v1110_v20 = vld [vmem:[%s1208_s26 + $0x90] ss:$8 sps:$4 sm:$0xff]   ;;  %v1113_v22 = vld [vmem:[%s1208_s26 + $0xa4] ss:$8 sps:$4 sm:$0xff]   ;;  %v1116_v24 = vld [vmem:[%s1208_s26 + $0xa0] ss:$8 sps:$4 sm:$0xff]  }
  0x14   : > { %514 = vmatprep.subr.bf16.mxu0 %v1155_v1  ;;  %1058 = vmatprep.subr.bf16.mxu1 %v1155_v1  ;;  %v1117_v25 = vld [vmem:[%s1208_s26 + $0x34] ss:$8 sps:$4 sm:$0xff]   ;;  %v1121_v27 = vld [vmem:[%s1208_s26 + $0x30] ss:$8 sps:$4 sm:$0xff]   ;;  %v1123_v29 = vld [vmem:[%s1208_s26 + $0x44] ss:$8 sps:$4 sm:$0xff]  }
  0x15   : > { %v1119_v26 = vld [vmem:[%s1208_s26 + $0xb4] ss:$8 sps:$4 sm:$0xff]   ;;  %v1122_v28 = vld [vmem:[%s1208_s26 + $0xb0] ss:$8 sps:$4 sm:$0xff]   ;;  %v1125_v30 = vld [vmem:[%s1208_s26 + $0xc4] ss:$8 sps:$4 sm:$0xff]  }
  0x16   : > { %v1127_v31 = vld [vmem:[%s1208_s26 + $0x40] ss:$8 sps:$4 sm:$0xff]   ;;  %v1129_v33 = vld [vmem:[%s1208_s26 + $0x54] ss:$8 sps:$4 sm:$0xff]   ;;  %v1133_v35 = vld [vmem:[%s1208_s26 + $0x50] ss:$8 sps:$4 sm:$0xff]  }
  0x17   : > { %515 = vmatpush1.bf16.msra.mxu0 %v1091_v6  ;;  %1070 = vmatpush1.bf16.msra.mxu1 %v1091_v6  ;;  %v1128_v32 = vld [vmem:[%s1208_s26 + $0xc0] ss:$8 sps:$4 sm:$0xff]   ;;  %v1131_v34 = vld [vmem:[%s1208_s26 + $0xd4] ss:$8 sps:$4 sm:$0xff]   ;;  %v1134_v36 = vld [vmem:[%s1208_s26 + $0xd0] ss:$8 sps:$4 sm:$0xff]  }
  0x18   : > { %516 = vmatprep.subr.bf16.mxu0 %v1155_v1  ;;  %1059 = vmatprep.subr.bf16.mxu1 %v1155_v1  ;;  %v1135_v37 = vld [vmem:[%s1208_s26 + $0x64] ss:$8 sps:$4 sm:$0xff]   ;;  %v1139_v39 = vld [vmem:[%s1208_s26 + $0x60] ss:$8 sps:$4 sm:$0xff]   ;;  %v1141_v41 = vld [vmem:[%s1208_s26 + $0x74] ss:$8 sps:$4 sm:$0xff]  }
  0x19   : > { %v1137_v38 = vld [vmem:[%s1208_s26 + $0xe4] ss:$8 sps:$4 sm:$0xff]   ;;  %v1140_v40 = vld [vmem:[%s1208_s26 + $0xe0] ss:$8 sps:$4 sm:$0xff]   ;;  %v1143_v42 = vld [vmem:[%s1208_s26 + $0xf4] ss:$8 sps:$4 sm:$0xff]  }
  0x1a   : > { %v1145_v43 = vld [vmem:[%s1208_s26 + $0x70] ss:$8 sps:$4 sm:$0xff]  }
  0x1b   : > { %517 = vmatpush1.bf16.msra.mxu0 %v1092_v8  ;;  %1071 = vmatpush1.bf16.msra.mxu1 %v1092_v8  ;;  %v1146_v44 = vld [vmem:[%s1208_s26 + $0xf0] ss:$8 sps:$4 sm:$0xff]  }
  0x1c   : > { %518 = vmatprep.subr.bf16.mxu0 %v1155_v1  ;;  %1060 = vmatprep.subr.bf16.mxu1 %v1155_v1 }
  0x1f   : > { %519 = vmatpush1.bf16.msra.mxu0 %v1093_v9  ;;  %1072 = vmatpush1.bf16.msra.mxu1 %v1093_v9 }
  0x20   : > { %520 = vmatprep.subr.bf16.mxu0 %v1155_v1  ;;  %1061 = vmatprep.subr.bf16.mxu1 %v1155_v1 }
  0x23   : > { %521 = vmatpush1.bf16.msra.mxu0 %v1094_v10  ;;  %1073 = vmatpush1.bf16.msra.mxu1 %v1094_v10 }
  0x24   : > { %522 = vmatprep.subr.bf16.mxu0 %v1155_v1  ;;  %1062 = vmatprep.subr.bf16.mxu1 %v1155_v1 }
  0x27   : > { %523 = vmatpush1.bf16.msra.mxu0 %v1095_v11  ;;  %1074 = vmatpush1.bf16.msra.mxu1 %v1095_v11 }
  0x28   : > { %524 = vmatprep.subr.bf16.mxu0 %v1155_v1  ;;  %1063 = vmatprep.subr.bf16.mxu1 %v1155_v1 }
  0x2b   : > { %525 = vmatpush1.bf16.msra.mxu0 %v1096_v12  ;;  %1075 = vmatpush1.bf16.msra.mxu1 %v1096_v12 }
  0x2c   : > { %526 = vmatprep.subr.bf16.mxu0 %v1155_v1  ;;  %1064 = vmatprep.subr.bf16.mxu1 %v1155_v1 }
  0x2f   : > { %527 = vmatpush1.bf16.msra.mxu0 %v1097_v13  ;;  %1076 = vmatpush1.bf16.msra.mxu1 %v1097_v13 }
  0x30   : > { %528 = vmatprep.subr.bf16.mxu0 %v1155_v1  ;;  %1065 = vmatprep.subr.bf16.mxu1 %v1155_v1 }
  0x33   : > { %529 = vmatpush1.bf16.msra.mxu0 %v1098_v14  ;;  %1077 = vmatpush1.bf16.msra.mxu1 %v1098_v14 }
  0x36   : > { %539 = vmatmul.mubr.bf16.vlgmr.msra.gmra.mrb[0].mxu0 %v1099_v15  ;;  %603 = vmatmul.mubr.bf16.vlgmr.msra.gmra.mrb[0].mxu1 %v1102_v16 }
  0x37   : > { %972 = vmatprep.mubr.msk.bf16.mxu0 %vm457_vm0, %v1105_v17  ;;  %980 = vmatprep.mubr.msk.bf16.mxu1 %vm457_vm0, %v1107_v18 }
  0x3e   : > { %547 = vmatmul.mubr.bf16.gmra.mrb[4].mxu0 %v1109_v19  ;;  %611 = vmatmul.mubr.bf16.gmra.mrb[4].mxu1 %v1110_v20 }
  0x3f   : > { %973 = vmatprep.mubr.msk.bf16.mxu0 %vm457_vm0, %v1111_v21  ;;  %981 = vmatprep.mubr.msk.bf16.mxu1 %vm457_vm0, %v1113_v22 }
  0x46   : > { %555 = vmatmul.mubr.bf16.gmra.mrb[8].mxu0 %v1115_v23  ;;  %619 = vmatmul.mubr.bf16.gmra.mrb[8].mxu1 %v1116_v24 }
  0x47   : > { %974 = vmatprep.mubr.msk.bf16.mxu0 %vm457_vm0, %v1117_v25  ;;  %982 = vmatprep.mubr.msk.bf16.mxu1 %vm457_vm0, %v1119_v26 }
  0x4e   : > { %563 = vmatmul.mubr.bf16.gmra.mrb[12].mxu0 %v1121_v27  ;;  %627 = vmatmul.mubr.bf16.gmra.mrb[12].mxu1 %v1122_v28 }
  0x4f   : > { %975 = vmatprep.mubr.msk.bf16.mxu0 %vm457_vm0, %v1123_v29  ;;  %983 = vmatprep.mubr.msk.bf16.mxu1 %vm457_vm0, %v1125_v30 }
  0x56   : > { %571 = vmatmul.mubr.bf16.gmra.mrb[16].mxu0 %v1127_v31  ;;  %635 = vmatmul.mubr.bf16.gmra.mrb[16].mxu1 %v1128_v32 }
  0x57   : > { %976 = vmatprep.mubr.msk.bf16.mxu0 %vm457_vm0, %v1129_v33  ;;  %984 = vmatprep.mubr.msk.bf16.mxu1 %vm457_vm0, %v1131_v34 }
  0x5e   : > { %579 = vmatmul.mubr.bf16.gmra.mrb[20].mxu0 %v1133_v35  ;;  %643 = vmatmul.mubr.bf16.gmra.mrb[20].mxu1 %v1134_v36 }
  0x5f   : > { %977 = vmatprep.mubr.msk.bf16.mxu0 %vm457_vm0, %v1135_v37  ;;  %985 = vmatprep.mubr.msk.bf16.mxu1 %vm457_vm0, %v1137_v38 }
  0x66   : > { %587 = vmatmul.mubr.bf16.gmra.mrb[24].mxu0 %v1139_v39  ;;  %651 = vmatmul.mubr.bf16.gmra.mrb[24].mxu1 %v1140_v40 }
  0x67   : > { %978 = vmatprep.mubr.msk.bf16.mxu0 %vm457_vm0, %v1141_v41  ;;  %986 = vmatprep.mubr.msk.bf16.mxu1 %vm457_vm0, %v1143_v42 }
  0x6e   : > { %595 = vmatmul.mubr.bf16.gmra.mrb[28].mxu0 %v1145_v43  ;;  %659 = vmatmul.mubr.bf16.gmra.mrb[28].mxu1 %v1146_v44 }
 0x109   : > { %v540_v46 = vpop.f32.mrb[0].mxu0  ;;  %v604_v47 = vpop.f32.mrb[0].mxu1 }
 0x10a   : > { %v541_v48 = vadd.f32 %v1303_v45, %v540_v46  ;;  %v605_v49 = vadd.f32 %v1303_v45, %v604_v47  ;;  %v542_v50 = vpop.f32.mrb[1].mxu0  ;;  %v606_v51 = vpop.f32.mrb[1].mxu1 }
 0x10b   : > { %v543_v52 = vpop.f32.mrb[2].mxu0  ;;  %v607_v53 = vpop.f32.mrb[2].mxu1 }
 0x10c   : > { %v667_v54 = vmax.f32 %v541_v48, 0.0  ;;  %v683_v55 = vmax.f32 %v605_v49, 0.0  ;;  %v544_v56 = vadd.f32 %v1303_v45, %v543_v52  ;;  %v608_v57 = vadd.f32 %v1303_v45, %v607_v53  ;;  %v545_v58 = vpop.f32.mrb[3].mxu0  ;;  %v609_v59 = vpop.f32.mrb[3].mxu1 }
 0x10e   : > { %v1022_v60 = vpack.c.bf16 %v667_v54, %v667_v54  ;;  %v1038_v61 = vpack.c.bf16 %v683_v55, %v683_v55  ;;  %v668_v62 = vmax.f32 %v544_v56, 0.0  ;;  %v684_v63 = vmax.f32 %v608_v57, 0.0 }
 0x110   : > { %828 = vst.msk [vmem:[%s1313_s16] sm:$0xf] %vm827_vm1, %v1022_v60  ;;  %844 = vst.msk [vmem:[%s1313_s16 + $0x40] sm:$0xf] %vm827_vm1, %v1038_v61  ;;  %v1023_v0 = vpack.c.bf16 %v668_v62, %v668_v62  ;;  %v1039_v1 = vpack.c.bf16 %v684_v63, %v684_v63 }
 0x111   : > { %v548_v2 = vpop.f32.mrb[4].mxu0  ;;  %v612_v3 = vpop.f32.mrb[4].mxu1 }
 0x112   : > { %829 = vst.msk [vmem:[%s1313_s16 + $0x4] sm:$0xf] %vm827_vm1, %v1023_v0  ;;  %845 = vst.msk [vmem:[%s1313_s16 + $0x44] sm:$0xf] %vm827_vm1, %v1039_v1  ;;  %v549_v4 = vadd.f32 %v1303_v45, %v548_v2  ;;  %v613_v5 = vadd.f32 %v1303_v45, %v612_v3  ;;  %v550_v6 = vpop.f32.mrb[5].mxu0  ;;  %v614_v7 = vpop.f32.mrb[5].mxu1 }
 0x113   : > { %v551_v8 = vpop.f32.mrb[6].mxu0  ;;  %v615_v9 = vpop.f32.mrb[6].mxu1 }
 0x114   : > { %v669_v10 = vmax.f32 %v549_v4, 0.0  ;;  %v685_v11 = vmax.f32 %v613_v5, 0.0  ;;  %v552_v12 = vadd.f32 %v1303_v45, %v551_v8  ;;  %v616_v13 = vadd.f32 %v1303_v45, %v615_v9  ;;  %v553_v14 = vpop.f32.mrb[7].mxu0  ;;  %v617_v15 = vpop.f32.mrb[7].mxu1 }
 0x116   : > { %v1024_v16 = vpack.c.bf16 %v669_v10, %v669_v10  ;;  %v1040_v17 = vpack.c.bf16 %v685_v11, %v685_v11  ;;  %v670_v18 = vmax.f32 %v552_v12, 0.0  ;;  %v686_v19 = vmax.f32 %v616_v13, 0.0 }
 0x118   : > { %830 = vst.msk [vmem:[%s1313_s16 + $0x8] sm:$0xf] %vm827_vm1, %v1024_v16  ;;  %846 = vst.msk [vmem:[%s1313_s16 + $0x48] sm:$0xf] %vm827_vm1, %v1040_v17  ;;  %v1025_v20 = vpack.c.bf16 %v670_v18, %v670_v18  ;;  %v1041_v21 = vpack.c.bf16 %v686_v19, %v686_v19 }
 0x119   : > { %v556_v22 = vpop.f32.mrb[8].mxu0  ;;  %v620_v23 = vpop.f32.mrb[8].mxu1 }
 0x11a   : > { %831 = vst.msk [vmem:[%s1313_s16 + $0xc] sm:$0xf] %vm827_vm1, %v1025_v20  ;;  %847 = vst.msk [vmem:[%s1313_s16 + $0x4c] sm:$0xf] %vm827_vm1, %v1041_v21  ;;  %v557_v24 = vadd.f32 %v1303_v45, %v556_v22  ;;  %v621_v25 = vadd.f32 %v1303_v45, %v620_v23  ;;  %v558_v26 = vpop.f32.mrb[9].mxu0  ;;  %v622_v27 = vpop.f32.mrb[9].mxu1 }
 0x11b   : > { %v559_v28 = vpop.f32.mrb[10].mxu0  ;;  %v623_v29 = vpop.f32.mrb[10].mxu1 }
 0x11c   : > { %v671_v30 = vmax.f32 %v557_v24, 0.0  ;;  %v687_v31 = vmax.f32 %v621_v25, 0.0  ;;  %v560_v32 = vadd.f32 %v1303_v45, %v559_v28  ;;  %v624_v33 = vadd.f32 %v1303_v45, %v623_v29  ;;  %v561_v34 = vpop.f32.mrb[11].mxu0  ;;  %v625_v35 = vpop.f32.mrb[11].mxu1 }
 0x11e   : > { %v1026_v36 = vpack.c.bf16 %v671_v30, %v671_v30  ;;  %v1042_v37 = vpack.c.bf16 %v687_v31, %v687_v31  ;;  %v672_v38 = vmax.f32 %v560_v32, 0.0  ;;  %v688_v39 = vmax.f32 %v624_v33, 0.0 }
 0x120   : > { %832 = vst.msk [vmem:[%s1313_s16 + $0x10] sm:$0xf] %vm827_vm1, %v1026_v36  ;;  %848 = vst.msk [vmem:[%s1313_s16 + $0x50] sm:$0xf] %vm827_vm1, %v1042_v37  ;;  %v1027_v40 = vpack.c.bf16 %v672_v38, %v672_v38  ;;  %v1043_v41 = vpack.c.bf16 %v688_v39, %v688_v39 }
 0x121   : > { %v564_v42 = vpop.f32.mrb[12].mxu0  ;;  %v628_v43 = vpop.f32.mrb[12].mxu1 }
 0x122   : > { %833 = vst.msk [vmem:[%s1313_s16 + $0x14] sm:$0xf] %vm827_vm1, %v1027_v40  ;;  %849 = vst.msk [vmem:[%s1313_s16 + $0x54] sm:$0xf] %vm827_vm1, %v1043_v41  ;;  %v565_v44 = vadd.f32 %v1303_v45, %v564_v42  ;;  %v629_v46 = vadd.f32 %v1303_v45, %v628_v43  ;;  %v566_v47 = vpop.f32.mrb[13].mxu0  ;;  %v630_v48 = vpop.f32.mrb[13].mxu1 }
 0x123   : > { %v567_v49 = vpop.f32.mrb[14].mxu0  ;;  %v631_v50 = vpop.f32.mrb[14].mxu1 }
 0x124   : > { %v673_v51 = vmax.f32 %v565_v44, 0.0  ;;  %v689_v52 = vmax.f32 %v629_v46, 0.0  ;;  %v568_v53 = vadd.f32 %v1303_v45, %v567_v49  ;;  %v632_v54 = vadd.f32 %v1303_v45, %v631_v50  ;;  %v569_v55 = vpop.f32.mrb[15].mxu0  ;;  %v633_v56 = vpop.f32.mrb[15].mxu1 }
 0x126   : > { %v1028_v57 = vpack.c.bf16 %v673_v51, %v673_v51  ;;  %v1044_v58 = vpack.c.bf16 %v689_v52, %v689_v52  ;;  %v674_v59 = vmax.f32 %v568_v53, 0.0  ;;  %v690_v60 = vmax.f32 %v632_v54, 0.0 }
 0x128   : > { %834 = vst.msk [vmem:[%s1313_s16 + $0x18] sm:$0xf] %vm827_vm1, %v1028_v57  ;;  %850 = vst.msk [vmem:[%s1313_s16 + $0x58] sm:$0xf] %vm827_vm1, %v1044_v58  ;;  %v1029_v61 = vpack.c.bf16 %v674_v59, %v674_v59  ;;  %v1045_v62 = vpack.c.bf16 %v690_v60, %v690_v60 }
 0x129   : > { %v572_v63 = vpop.f32.mrb[16].mxu0  ;;  %v636_v0 = vpop.f32.mrb[16].mxu1 }
 0x12a   : > { %835 = vst.msk [vmem:[%s1313_s16 + $0x1c] sm:$0xf] %vm827_vm1, %v1029_v61  ;;  %851 = vst.msk [vmem:[%s1313_s16 + $0x5c] sm:$0xf] %vm827_vm1, %v1045_v62  ;;  %v573_v1 = vadd.f32 %v1303_v45, %v572_v63  ;;  %v637_v2 = vadd.f32 %v1303_v45, %v636_v0  ;;  %v574_v3 = vpop.f32.mrb[17].mxu0  ;;  %v638_v4 = vpop.f32.mrb[17].mxu1 }
 0x12b   : > { %v575_v5 = vpop.f32.mrb[18].mxu0  ;;  %v639_v6 = vpop.f32.mrb[18].mxu1 }
 0x12c   : > { %v675_v7 = vmax.f32 %v573_v1, 0.0  ;;  %v691_v8 = vmax.f32 %v637_v2, 0.0  ;;  %v576_v9 = vadd.f32 %v1303_v45, %v575_v5  ;;  %v640_v10 = vadd.f32 %v1303_v45, %v639_v6  ;;  %v577_v11 = vpop.f32.mrb[19].mxu0  ;;  %v641_v12 = vpop.f32.mrb[19].mxu1 }
 0x12e   : > { %v1030_v13 = vpack.c.bf16 %v675_v7, %v675_v7  ;;  %v1046_v14 = vpack.c.bf16 %v691_v8, %v691_v8  ;;  %v676_v15 = vmax.f32 %v576_v9, 0.0  ;;  %v692_v16 = vmax.f32 %v640_v10, 0.0 }
 0x130   : > { %836 = vst.msk [vmem:[%s1313_s16 + $0x20] sm:$0xf] %vm827_vm1, %v1030_v13  ;;  %852 = vst.msk [vmem:[%s1313_s16 + $0x60] sm:$0xf] %vm827_vm1, %v1046_v14  ;;  %v1031_v17 = vpack.c.bf16 %v676_v15, %v676_v15  ;;  %v1047_v18 = vpack.c.bf16 %v692_v16, %v692_v16 }
 0x131   : > { %v580_v19 = vpop.f32.mrb[20].mxu0  ;;  %v644_v20 = vpop.f32.mrb[20].mxu1 }
 0x132   : > { %837 = vst.msk [vmem:[%s1313_s16 + $0x24] sm:$0xf] %vm827_vm1, %v1031_v17  ;;  %853 = vst.msk [vmem:[%s1313_s16 + $0x64] sm:$0xf] %vm827_vm1, %v1047_v18  ;;  %v581_v21 = vadd.f32 %v1303_v45, %v580_v19  ;;  %v645_v22 = vadd.f32 %v1303_v45, %v644_v20  ;;  %v582_v23 = vpop.f32.mrb[21].mxu0  ;;  %v646_v24 = vpop.f32.mrb[21].mxu1 }
 0x133   : > { %v583_v25 = vpop.f32.mrb[22].mxu0  ;;  %v647_v26 = vpop.f32.mrb[22].mxu1 }
 0x134   : > { %v677_v27 = vmax.f32 %v581_v21, 0.0  ;;  %v693_v28 = vmax.f32 %v645_v22, 0.0  ;;  %v584_v29 = vadd.f32 %v1303_v45, %v583_v25  ;;  %v648_v30 = vadd.f32 %v1303_v45, %v647_v26  ;;  %v585_v31 = vpop.f32.mrb[23].mxu0  ;;  %v649_v32 = vpop.f32.mrb[23].mxu1 }
 0x136   : > { %v1032_v33 = vpack.c.bf16 %v677_v27, %v677_v27  ;;  %v1048_v34 = vpack.c.bf16 %v693_v28, %v693_v28  ;;  %v678_v35 = vmax.f32 %v584_v29, 0.0  ;;  %v694_v36 = vmax.f32 %v648_v30, 0.0 }
 0x138   : > { %838 = vst.msk [vmem:[%s1313_s16 + $0x28] sm:$0xf] %vm827_vm1, %v1032_v33  ;;  %854 = vst.msk [vmem:[%s1313_s16 + $0x68] sm:$0xf] %vm827_vm1, %v1048_v34  ;;  %v1033_v37 = vpack.c.bf16 %v678_v35, %v678_v35  ;;  %v1049_v38 = vpack.c.bf16 %v694_v36, %v694_v36 }
 0x139   : > { %v588_v39 = vpop.f32.mrb[24].mxu0  ;;  %v652_v40 = vpop.f32.mrb[24].mxu1 }
 0x13a   : > { %839 = vst.msk [vmem:[%s1313_s16 + $0x2c] sm:$0xf] %vm827_vm1, %v1033_v37  ;;  %855 = vst.msk [vmem:[%s1313_s16 + $0x6c] sm:$0xf] %vm827_vm1, %v1049_v38  ;;  %v589_v41 = vadd.f32 %v1303_v45, %v588_v39  ;;  %v653_v42 = vadd.f32 %v1303_v45, %v652_v40  ;;  %v590_v43 = vpop.f32.mrb[25].mxu0  ;;  %v654_v44 = vpop.f32.mrb[25].mxu1 }
 0x13b   : > { %v591_v46 = vpop.f32.mrb[26].mxu0  ;;  %v655_v47 = vpop.f32.mrb[26].mxu1 }
 0x13c   : > { %v679_v48 = vmax.f32 %v589_v41, 0.0  ;;  %v695_v49 = vmax.f32 %v653_v42, 0.0  ;;  %v592_v50 = vadd.f32 %v1303_v45, %v591_v46  ;;  %v656_v51 = vadd.f32 %v1303_v45, %v655_v47  ;;  %v593_v52 = vpop.f32.mrb[27].mxu0  ;;  %v657_v53 = vpop.f32.mrb[27].mxu1 }
 0x13e   : > { %v1034_v54 = vpack.c.bf16 %v679_v48, %v679_v48  ;;  %v1050_v55 = vpack.c.bf16 %v695_v49, %v695_v49  ;;  %v680_v56 = vmax.f32 %v592_v50, 0.0  ;;  %v696_v57 = vmax.f32 %v656_v51, 0.0 }
 0x140   : > { %840 = vst.msk [vmem:[%s1313_s16 + $0x30] sm:$0xf] %vm827_vm1, %v1034_v54  ;;  %856 = vst.msk [vmem:[%s1313_s16 + $0x70] sm:$0xf] %vm827_vm1, %v1050_v55  ;;  %v1035_v58 = vpack.c.bf16 %v680_v56, %v680_v56  ;;  %v1051_v59 = vpack.c.bf16 %v696_v57, %v696_v57 }
 0x141   : > { %v596_v60 = vpop.f32.mrb[28].mxu0  ;;  %v660_v61 = vpop.f32.mrb[28].mxu1 }
 0x142   : > { %841 = vst.msk [vmem:[%s1313_s16 + $0x34] sm:$0xf] %vm827_vm1, %v1035_v58  ;;  %857 = vst.msk [vmem:[%s1313_s16 + $0x74] sm:$0xf] %vm827_vm1, %v1051_v59  ;;  %v597_v62 = vadd.f32 %v1303_v45, %v596_v60  ;;  %v661_v63 = vadd.f32 %v1303_v45, %v660_v61  ;;  %v598_v0 = vpop.f32.mrb[29].mxu0  ;;  %v662_v1 = vpop.f32.mrb[29].mxu1 }
 0x143   : > { %v599_v2 = vpop.f32.mrb[30].mxu0  ;;  %v663_v3 = vpop.f32.mrb[30].mxu1 }
 0x144   : > { %v681_v4 = vmax.f32 %v597_v62, 0.0  ;;  %v697_v5 = vmax.f32 %v661_v63, 0.0  ;;  %v600_v6 = vadd.f32 %v1303_v45, %v599_v2  ;;  %v664_v7 = vadd.f32 %v1303_v45, %v663_v3  ;;  %v601_v8 = vpop.f32.mrb[31].mxu0  ;;  %v665_v9 = vpop.f32.mrb[31].mxu1 }
 0x146   : > { %v1036_v10 = vpack.c.bf16 %v681_v4, %v681_v4  ;;  %v1052_v11 = vpack.c.bf16 %v697_v5, %v697_v5  ;;  %v682_v12 = vmax.f32 %v600_v6, 0.0  ;;  %v698_v13 = vmax.f32 %v664_v7, 0.0 }
 0x148   : > { %842 = vst.msk [vmem:[%s1313_s16 + $0x38] sm:$0xf] %vm827_vm1, %v1036_v10  ;;  %858 = vst.msk [vmem:[%s1313_s16 + $0x78] sm:$0xf] %vm827_vm1, %v1052_v11  ;;  %v1037_v14 = vpack.c.bf16 %v682_v12, %v682_v12  ;;  %v1053_v15 = vpack.c.bf16 %v698_v13, %v698_v13 }
 0x14a   : > { %843 = vst.msk [vmem:[%s1313_s16 + $0x3c] sm:$0xf] %vm827_vm1, %v1037_v14  ;;  %859 = vst.msk [vmem:[%s1313_s16 + $0x7c] sm:$0xf] %vm827_vm1, %v1053_v15 }
 0x14b PF: > { %s13_s12 = sadd.s32 1, %s1153_s12  }
 0x14c   : > { %p10_p4 = scmp.ge.s32.totalorder %s13_s12, 4  }
 0x14e   :  { %12 = sbr.rel (!%p10_p4) target bundleno = 1 (0x1), region = 62 }

// kernel: small_net_forward.4
= control target key start
LH: loop header
LB: loop body
LE: loop exit
PB: predicated region body
PF: predicated region fallthrough
CT: control target
= control target key end

     0   :  { %s705_s12 = smov 0   ;;  %s805_s0 = inlined_call_operand.vmem [shape: bf16[128,256], index: 0, kind: input, shape index: {}]   ;;  %s806_s1 = inlined_call_operand.vmem [shape: bf16[256,32], index: 1, kind: input, shape index: {}]   ;;  %s807_s2 = inlined_call_operand.vmem [shape: f32[1,32], index: 2, kind: input, shape index: {}]   ;;  %s808_s3 = inlined_call_operand.vmem [shape: bf16[128,32], index: 3, kind: output, shape index: {}]  }
   0x1 LB: > { %s531_s13 = sadd.s32 4294967295, %s683_s12   ;;  %p535_p0 = scmp.ge.s32.totalorder %s683_s12, 1  ;;  %s683_s12 = sphi %s705_s12, %s13_s12  }
   0x2   : > { %p139_p1 = scmp.lt.s32.totalorder %s683_s12, 3 }
   0x4   : > { %p140_p2 = pnand %p535_p0, %p139_p1 }
   0x5   : > { %v649_v0 = vld [vmem:[%s806_s1 + $0x40] sm:$0xff] (!%p140_p2)   ;;  %s536_s16 = sshll.u32 (!%p140_p2), %s531_s13, 3  ;;  %v651_v2 = vld [vmem:[%s806_s1 + $0x48] sm:$0xff] (!%p140_p2)   ;;  %v653_v4 = vld [vmem:[%s806_s1 + $0x50] sm:$0xff] (!%p140_p2)   ;;  %vm466_vm0 = vcmask (!%p140_p2), 257024  }
   0x6   : > { %143 = sbr.rel (%p140_p2) target bundleno = 270 (0x10e), region = 32  ;;  %v650_v1 = vld [vmem:[%s806_s1] sm:$0xff] (!%p140_p2)   ;;  %585 = vmatprep.subr.bf16.mxu0 (!%p140_p2), %v649_v0  ;;  %625 = vmatprep.subr.bf16.mxu1 (!%p140_p2), %v649_v0  ;;  %v652_v3 = vld [vmem:[%s806_s1 + $0x8] sm:$0xff] (!%p140_p2)   ;;  %p165_p3 = scmp.lt.s32.totalorder (!%p140_p2), %s536_s16, 15  ;;  %v654_v5 = vld [vmem:[%s806_s1 + $0x10] sm:$0xff] (!%p140_p2)  }
   0x7   : > { %586 = vmatpush3.bf16.msra.mxu0 (!%p140_p2), %v650_v1  ;;  %633 = vmatpush3.bf16.msra.mxu1 (!%p140_p2), %v650_v1  ;;  %v655_v6 = vld [vmem:[%s806_s1 + $0x58] sm:$0xff] (!%p140_p2)   ;;  %v657_v8 = vld [vmem:[%s806_s1 + $0x60] sm:$0xff] (!%p140_p2)   ;;  %v659_v10 = vld [vmem:[%s806_s1 + $0x68] sm:$0xff] (!%p140_p2)  }
   0x8   : > { %587 = vmatprep.subr.bf16.mxu0 (!%p140_p2), %v651_v2  ;;  %626 = vmatprep.subr.bf16.mxu1 (!%p140_p2), %v651_v2  ;;  %v656_v7 = vld [vmem:[%s806_s1 + $0x18] sm:$0xff] (!%p140_p2)   ;;  %v658_v9 = vld [vmem:[%s806_s1 + $0x20] sm:$0xff] (!%p140_p2)   ;;  %v660_v13 = vld [vmem:[%s806_s1 + $0x28] sm:$0xff] (!%p140_p2)  }
   0x9   : > { %v661_v14 = vld [vmem:[%s806_s1 + $0x70] sm:$0xff] (!%p140_p2)   ;;  %v663_v16 = vld [vmem:[%s806_s1 + $0x78] sm:$0xff] (!%p140_p2)   ;;  %v541_v26 = vld [vmem:[%s807_s2] ss:$0 sm:$0xff] (!%p140_p2) }
   0xa   : > { %v662_v15 = vld [vmem:[%s806_s1 + $0x30] sm:$0xff] (!%p140_p2)   ;;  %v664_v17 = vld [vmem:[%s806_s1 + $0x38] sm:$0xff] (!%p140_p2)  }
   0xb   : > { %588 = vmatpush3.bf16.msra.mxu0 (!%p140_p2), %v652_v3  ;;  %634 = vmatpush3.bf16.msra.mxu1 (!%p140_p2), %v652_v3 }
   0xc   : > { %589 = vmatprep.subr.bf16.mxu0 (!%p140_p2), %v653_v4  ;;  %627 = vmatprep.subr.bf16.mxu1 (!%p140_p2), %v653_v4 }
   0xd   : > { %s810_s16 = smov (!%p165_p3, %s536_s16), 15 }
   0xe   : > { %s576_s4 = sshll.u32 %s810_s16, 3  ;;  %s540_s28 = sshll.u32 %s810_s16, 2 }
   0xf   : > { %590 = vmatpush3.bf16.msra.mxu0 %v654_v5  ;;  %635 = vmatpush3.bf16.msra.mxu1 %v654_v5  ;;  %s746_s9 = scalar_lea.vmem %s805_s0, %s576_s4  ;;  %s784_s4 = scalar_lea.vmem %s808_s3, %s540_s28 }
  0x10   : > { %591 = vmatprep.subr.bf16.mxu0 %v655_v6  ;;  %628 = vmatprep.subr.bf16.mxu1 %v655_v6  ;;  %v667_v11 = vld [vmem:[%s746_s9 + $0x4] ss:$8 sps:$4 sm:$0xff]   ;;  %v665_v18 = vld [vmem:[%s746_s9] ss:$8 sps:$4 sm:$0xff]   ;;  %v671_v20 = vld [vmem:[%s746_s9 + $0x14] ss:$8 sps:$4 sm:$0xff]  }
  0x11   : > { %v670_v12 = vld [vmem:[%s746_s9 + $0x24] ss:$8 sps:$4 sm:$0xff]   ;;  %393 = vmatprep.mubr.bf16.mxu0 %v667_v11  ;;  %v668_v19 = vld [vmem:[%s746_s9 + $0x20] ss:$8 sps:$4 sm:$0xff]   ;;  %v673_v21 = vld [vmem:[%s746_s9 + $0x34] ss:$8 sps:$4 sm:$0xff]  }
  0x12   : > { %409 = vmatprep.mubr.bf16.mxu1 %v670_v12  ;;  %v675_v22 = vld [vmem:[%s746_s9 + $0x10] ss:$8 sps:$4 sm:$0xff]  }
  0x13   : > { %592 = vmatpush3.bf16.msra.mxu0 %v656_v7  ;;  %636 = vmatpush3.bf16.msra.mxu1 %v656_v7  ;;  %v676_v23 = vld [vmem:[%s746_s9 + $0x30] ss:$8 sps:$4 sm:$0xff]  }
  0x14   : > { %593 = vmatprep.subr.bf16.mxu0 %v657_v8  ;;  %629 = vmatprep.subr.bf16.mxu1 %v657_v8 }
  0x17   : > { %594 = vmatpush3.bf16.msra.mxu0 %v658_v9  ;;  %637 = vmatpush3.bf16.msra.mxu1 %v658_v9 }
  0x18   : > { %595 = vmatprep.subr.bf16.mxu0 %v659_v10  ;;  %630 = vmatprep.subr.bf16.mxu1 %v659_v10 }
  0x1b   : > { %596 = vmatpush3.bf16.msra.mxu0 %v660_v13  ;;  %638 = vmatpush3.bf16.msra.mxu1 %v660_v13 }
  0x1c   : > { %597 = vmatprep.subr.bf16.mxu0 %v661_v14  ;;  %631 = vmatprep.subr.bf16.mxu1 %v661_v14 }
  0x1f   : > { %598 = vmatpush3.bf16.msra.mxu0 %v662_v15  ;;  %639 = vmatpush3.bf16.msra.mxu1 %v662_v15 }
  0x20   : > { %599 = vmatprep.subr.bf16.mxu0 %v663_v16  ;;  %632 = vmatprep.subr.bf16.mxu1 %v663_v16 }
  0x23   : > { %600 = vmatpush3.bf16.msra.mxu0 %v664_v17  ;;  %640 = vmatpush3.bf16.msra.mxu1 %v664_v17 }
  0x26   : > { %394 = vmatmul.mubr.bf16.vlgmr.msra.gmra.mrb[0].mxu0 %v665_v18  ;;  %410 = vmatmul.mubr.bf16.vlgmr.msra.gmra.mrb[0].mxu1 %v668_v19 }
  0x27   : > { %401 = vmatprep.mubr.bf16.mxu0 %v671_v20  ;;  %417 = vmatprep.mubr.bf16.mxu1 %v673_v21 }
  0x2e   : > { %402 = vmatmul.mubr.bf16.gmra.mrb[4].mxu0 %v675_v22  ;;  %418 = vmatmul.mubr.bf16.gmra.mrb[4].mxu1 %v676_v23 }
  0xf9   : > { %v601_v24 = vpop.f32.mrb[0].mxu0  ;;  %v613_v25 = vpop.f32.mrb[0].mxu1 }
  0xfa   : > { %v602_v27 = vpop.f32.mrb[1].mxu0  ;;  %v614_v28 = vpop.f32.mrb[1].mxu1 }
  0xfb   : > { %v603_v29 = vadd.f32 %v602_v27, %v601_v24  ;;  %v615_v30 = vadd.f32 %v614_v28, %v613_v25  ;;  %v604_v31 = vpop.f32.mrb[2].mxu0  ;;  %v616_v32 = vpop.f32.mrb[2].mxu1 }
  0xfc   : > { %v605_v33 = vpop.f32.mrb[3].mxu0  ;;  %v617_v34 = vpop.f32.mrb[3].mxu1 }
  0xfd   : > { %v396_v35 = vadd.f32 %v603_v29, %v541_v26  ;;  %v412_v36 = vadd.f32 %v615_v30, %v541_v26  ;;  %v606_v37 = vadd.f32 %v605_v33, %v604_v31  ;;  %v618_v38 = vadd.f32 %v617_v34, %v616_v32 }
  0xff   : > { %v426_v39 = vmax.f32 %v396_v35, 0.0  ;;  %v430_v40 = vmax.f32 %v412_v36, 0.0  ;;  %v399_v41 = vadd.f32 %v606_v37, %v541_v26  ;;  %v415_v42 = vadd.f32 %v618_v38, %v541_v26 }
 0x101   : > { %v577_v43 = vpack.c.bf16 %v426_v39, %v426_v39  ;;  %v581_v44 = vpack.c.bf16 %v430_v40, %v430_v40  ;;  %v427_v45 = vmax.f32 %v399_v41, 0.0  ;;  %v431_v46 = vmax.f32 %v415_v42, 0.0  ;;  %v607_v47 = vpop.f32.mrb[4].mxu0  ;;  %v619_v48 = vpop.f32.mrb[4].mxu1 }
 0x102   : > { %v608_v49 = vpop.f32.mrb[5].mxu0  ;;  %v620_v50 = vpop.f32.mrb[5].mxu1 }
 0x103   : > { %467 = vst.msk [vmem:[%s784_s4] sm:$0xf] %vm466_vm0, %v577_v43  ;;  %471 = vst.msk [vmem:[%s784_s4 + $0x10] sm:$0xf] %vm466_vm0, %v581_v44  ;;  %v578_v51 = vpack.c.bf16 %v427_v45, %v427_v45  ;;  %v582_v52 = vpack.c.bf16 %v431_v46, %v431_v46  ;;  %v609_v53 = vadd.f32 %v608_v49, %v607_v47  ;;  %v610_v55 = vpop.f32.mrb[6].mxu0  ;;  %v622_v56 = vpop.f32.mrb[6].mxu1 }
 0x104   : > { %v621_v54 = vadd.f32 %v620_v50, %v619_v48  ;;  %v611_v57 = vpop.f32.mrb[7].mxu0  ;;  %v623_v58 = vpop.f32.mrb[7].mxu1 }
 0x105   : > { %468 = vst.msk [vmem:[%s784_s4 + $0x4] sm:$0xf] %vm466_vm0, %v578_v51  ;;  %472 = vst.msk [vmem:[%s784_s4 + $0x14] sm:$0xf] %vm466_vm0, %v582_v52  ;;  %v404_v59 = vadd.f32 %v609_v53, %v541_v26  ;;  %v612_v61 = vadd.f32 %v611_v57, %v610_v55  ;;  %v624_v62 = vadd.f32 %v623_v58, %v622_v56 }
 0x106   : > { %v420_v60 = vadd.f32 %v621_v54, %v541_v26 }
 0x107   : > { %v428_v63 = vmax.f32 %v404_v59, 0.0  ;;  %v407_v1 = vadd.f32 %v612_v61, %v541_v26  ;;  %v423_v2 = vadd.f32 %v624_v62, %v541_v26 }
 0x108   : > { %v432_v0 = vmax.f32 %v420_v60, 0.0 }
 0x109   : > { %v579_v3 = vpack.c.bf16 %v428_v63, %v428_v63  ;;  %v429_v5 = vmax.f32 %v407_v1, 0.0  ;;  %v433_v6 = vmax.f32 %v423_v2, 0.0 }
 0x10a   : > { %v583_v4 = vpack.c.bf16 %v432_v0, %v432_v0 }
 0x10b   : > { %469 = vst.msk [vmem:[%s784_s4 + $0x8] sm:$0xf] %vm466_vm0, %v579_v3  ;;  %v580_v7 = vpack.c.bf16 %v429_v5, %v429_v5  ;;  %v584_v8 = vpack.c.bf16 %v433_v6, %v433_v6 }
 0x10c   : > { %473 = vst.msk [vmem:[%s784_s4 + $0x18] sm:$0xf] %vm466_vm0, %v583_v4 }
 0x10d   : > { %470 = vst.msk [vmem:[%s784_s4 + $0xc] sm:$0xf] %vm466_vm0, %v580_v7  ;;  %474 = vst.msk [vmem:[%s784_s4 + $0x1c] sm:$0xf] %vm466_vm0, %v584_v8 }
 0x10e PF: > { %s13_s12 = sadd.s32 1, %s683_s12  }
 0x10f   : > { %p10_p4 = scmp.ge.s32.totalorder %s13_s12, 4  }
 0x111   :  { %12 = sbr.rel (!%p10_p4) target bundleno = 1 (0x1), region = 62 }

// kernel: small_net_forward.5
= control target key start
LH: loop header
LB: loop body
LE: loop exit
PB: predicated region body
PF: predicated region fallthrough
CT: control target
= control target key end

     0   :  { %s3668_s0 = inlined_call_operand.vmem [shape: bf16[2,2048], index: 0, kind: input, shape index: {}]   ;;  %s3669_s1 = inlined_call_operand.vmem [shape: bf16[2048,256], index: 1, kind: input, shape index: {}]   ;;  %s3670_s2 = inlined_call_operand.vmem [shape: f32[1,256], index: 2, kind: input, shape index: {}]   ;;  %s3671_s3 = inlined_call_operand.vmem [shape: f32[1,256], index: 3, kind: input, shape index: {}]   ;;  %s3672_s4 = inlined_call_operand.<no memory space> [shape: f32[1,1], index: 4, kind: input, shape index: {}]   ;;  %s3673_s5 = inlined_call_operand.hbm [shape: f32[2,256], index: 5, kind: output, shape index: {0}]   ;;  %s3674_s6 = inlined_call_operand.vmem [shape: f32[2,1], index: 6, kind: output, shape index: {1}]  }
   0x1   :  { %v12_v0 = vstv %s3672_s4 }
   0x2   :  { %13 = vst [vmem:[#allocation2] sm:$0x1] %v12_v0 }
   0x3   :  { %v2369_v1 = vld [vmem:[%s3669_s1 + $0x4] ss:$8 sps:$4 sm:$0xff]   ;;  %v2373_v3 = vld [vmem:[%s3669_s1] ss:$8 sps:$4 sm:$0xff]   ;;  %v2375_v5 = vld [vmem:[%s3669_s1 + $0x14] ss:$8 sps:$4 sm:$0xff]   ;;  %v285_v37 = vlaneseq }
   0x4   :  { %v2371_v2 = vld [vmem:[%s3669_s1 + $0x404] ss:$8 sps:$4 sm:$0xff]   ;;  %1691 = vmatprep.subr.bf16.mxu1 %v2369_v1  ;;  %v2374_v4 = vld [vmem:[%s3669_s1 + $0x400] ss:$8 sps:$4 sm:$0xff]   ;;  %v2377_v6 = vld [vmem:[%s3669_s1 + $0x414] ss:$8 sps:$4 sm:$0xff]  }
   0x5   :  { %1855 = vmatprep.subr.bf16.mxu0 %v2371_v2  ;;  %1692 = vmatpush1.bf16.msra.mxu1 %v2373_v3  ;;  %v2379_v7 = vld [vmem:[%s3669_s1 + $0x10] ss:$8 sps:$4 sm:$0xff]   ;;  %v2381_v9 = vld [vmem:[%s3669_s1 + $0x24] ss:$8 sps:$4 sm:$0xff]   ;;  %v2385_v11 = vld [vmem:[%s3669_s1 + $0x20] ss:$8 sps:$4 sm:$0xff]  }
   0x6   :  { %1856 = vmatpush1.bf16.msra.mxu0 %v2374_v4  ;;  %1693 = vmatprep.subr.bf16.mxu1 %v2375_v5  ;;  %v2380_v8 = vld [vmem:[%s3669_s1 + $0x410] ss:$8 sps:$4 sm:$0xff]   ;;  %v2383_v10 = vld [vmem:[%s3669_s1 + $0x424] ss:$8 sps:$4 sm:$0xff]   ;;  %v2386_v12 = vld [vmem:[%s3669_s1 + $0x420] ss:$8 sps:$4 sm:$0xff]  }
   0x7   :  { %1857 = vmatprep.subr.bf16.mxu0 %v2377_v6  ;;  %v2387_v13 = vld [vmem:[%s3669_s1 + $0x34] ss:$8 sps:$4 sm:$0xff]   ;;  %v2391_v15 = vld [vmem:[%s3669_s1 + $0x30] ss:$8 sps:$4 sm:$0xff]   ;;  %v2393_v17 = vld [vmem:[%s3669_s1 + $0x44] ss:$8 sps:$4 sm:$0xff]  }
   0x8   :  { %v2389_v14 = vld [vmem:[%s3669_s1 + $0x434] ss:$8 sps:$4 sm:$0xff]   ;;  %v2392_v16 = vld [vmem:[%s3669_s1 + $0x430] ss:$8 sps:$4 sm:$0xff]   ;;  %v2395_v18 = vld [vmem:[%s3669_s1 + $0x444] ss:$8 sps:$4 sm:$0xff]  }
   0x9   :  { %1694 = vmatpush1.bf16.msra.mxu1 %v2379_v7  ;;  %v2397_v19 = vld [vmem:[%s3669_s1 + $0x40] ss:$8 sps:$4 sm:$0xff]   ;;  %v2399_v21 = vld [vmem:[%s3669_s1 + $0x54] ss:$8 sps:$4 sm:$0xff]   ;;  %v2403_v23 = vld [vmem:[%s3669_s1 + $0x50] ss:$8 sps:$4 sm:$0xff]  }
   0xa   :  { %1858 = vmatpush1.bf16.msra.mxu0 %v2380_v8  ;;  %1695 = vmatprep.subr.bf16.mxu1 %v2381_v9  ;;  %v2398_v20 = vld [vmem:[%s3669_s1 + $0x440] ss:$8 sps:$4 sm:$0xff]   ;;  %v2401_v22 = vld [vmem:[%s3669_s1 + $0x454] ss:$8 sps:$4 sm:$0xff]   ;;  %v2404_v24 = vld [vmem:[%s3669_s1 + $0x450] ss:$8 sps:$4 sm:$0xff]  }
   0xb   :  { %1859 = vmatprep.subr.bf16.mxu0 %v2383_v10  ;;  %v2405_v25 = vld [vmem:[%s3669_s1 + $0x64] ss:$8 sps:$4 sm:$0xff]   ;;  %v2409_v27 = vld [vmem:[%s3669_s1 + $0x60] ss:$8 sps:$4 sm:$0xff]   ;;  %v2411_v29 = vld [vmem:[%s3669_s1 + $0x74] ss:$8 sps:$4 sm:$0xff]  }
   0xc   :  { %v2407_v26 = vld [vmem:[%s3669_s1 + $0x464] ss:$8 sps:$4 sm:$0xff]   ;;  %v2410_v28 = vld [vmem:[%s3669_s1 + $0x460] ss:$8 sps:$4 sm:$0xff]   ;;  %v2413_v30 = vld [vmem:[%s3669_s1 + $0x474] ss:$8 sps:$4 sm:$0xff]  }
   0xd   :  { %1696 = vmatpush1.bf16.msra.mxu1 %v2385_v11  ;;  %v2415_v31 = vld [vmem:[%s3669_s1 + $0x70] ss:$8 sps:$4 sm:$0xff]   ;;  %v2417_v33 = vld [vmem:[%s3669_s1 + $0x84] ss:$8 sps:$4 sm:$0xff]   ;;  %v2421_v35 = vld [vmem:[%s3669_s1 + $0x80] ss:$8 sps:$4 sm:$0xff]  }
   0xe   :  { %1860 = vmatpush1.bf16.msra.mxu0 %v2386_v12  ;;  %1697 = vmatprep.subr.bf16.mxu1 %v2387_v13  ;;  %v2416_v32 = vld [vmem:[%s3669_s1 + $0x470] ss:$8 sps:$4 sm:$0xff]   ;;  %v2419_v34 = vld [vmem:[%s3669_s1 + $0x484] ss:$8 sps:$4 sm:$0xff]   ;;  %v2422_v36 = vld [vmem:[%s3669_s1 + $0x480] ss:$8 sps:$4 sm:$0xff]  }
   0xf   :  { %1861 = vmatprep.subr.bf16.mxu0 %v2389_v14  ;;  %v2779_v38 = vmov 1966171168   ;;  %v2423_v40 = vld [vmem:[%s3669_s1 + $0x94] ss:$8 sps:$4 sm:$0xff]   ;;  %v2427_v42 = vld [vmem:[%s3669_s1 + $0x90] ss:$8 sps:$4 sm:$0xff]  }
  0x10   :  { %v299_v39 = vunpack.c.l.s4 %v2779_v38  ;;  %v2425_v41 = vld [vmem:[%s3669_s1 + $0x494] ss:$8 sps:$4 sm:$0xff]   ;;  %v2936_v43 = vshrl.u32 %v285_v37, 7  ;;  %v2428_v45 = vld [vmem:[%s3669_s1 + $0x490] ss:$8 sps:$4 sm:$0xff]   ;;  %v25_v53 = vld [vmem:[%s3668_s0] sm:$0xff] }
  0x11   :  { %1698 = vmatpush1.bf16.msra.mxu1 %v2391_v15  ;;  %v2429_v46 = vld [vmem:[%s3669_s1 + $0xa4] ss:$8 sps:$4 sm:$0xff]   ;;  %v2433_v48 = vld [vmem:[%s3669_s1 + $0xa0] ss:$8 sps:$4 sm:$0xff]   ;;  %v2435_v51 = vld [vmem:[%s3669_s1 + $0xb4] ss:$8 sps:$4 sm:$0xff]   ;;  %v297_v13 = vcombine.high %v25_v53, %v25_v53 }
  0x12   :  { %1862 = vmatpush1.bf16.msra.mxu0 %v2392_v16  ;;  %1699 = vmatprep.subr.bf16.mxu1 %v2393_v17  ;;  %v300_v44 = vunpack.c.0.s8 %v299_v39  ;;  %v2431_v47 = vld [vmem:[%s3669_s1 + $0x4a4] ss:$8 sps:$4 sm:$0xff]   ;;  %v2434_v49 = vld [vmem:[%s3669_s1 + $0x4a0] ss:$8 sps:$4 sm:$0xff]   ;;  %v2437_v52 = vld [vmem:[%s3669_s1 + $0x4b4] ss:$8 sps:$4 sm:$0xff]  }
  0x13   :  { %1863 = vmatprep.subr.bf16.mxu0 %v2395_v18  ;;  %v2439_v54 = vld [vmem:[%s3669_s1 + $0xb0] ss:$8 sps:$4 sm:$0xff]   ;;  %v26_v57 = vld [vmem:[%s3668_s0 + $0x8] sm:$0xff]  ;;  %v2447_v2 = vld [vmem:[%s3669_s1 + $0xd4] ss:$8 sps:$4 sm:$0xff]  }
  0x14   :  { %v2954_v50 = vsub.s32 %v300_v44, %v2936_v43  ;;  %v2440_v56 = vld [vmem:[%s3669_s1 + $0x4b0] ss:$8 sps:$4 sm:$0xff]   ;;  %v2441_v58 = vld [vmem:[%s3669_s1 + $0xc4] ss:$8 sps:$4 sm:$0xff]   ;;  %v2445_v0 = vld [vmem:[%s3669_s1 + $0xc0] ss:$8 sps:$4 sm:$0xff]   ;;  %v346_v14 = vcombine.high %v26_v57, %v26_v57 }
  0x15   :  { %1700 = vmatpush1.bf16.msra.mxu1 %v2397_v19  ;;  %v2443_v59 = vld [vmem:[%s3669_s1 + $0x4c4] ss:$8 sps:$4 sm:$0xff]   ;;  %v2446_v1 = vld [vmem:[%s3669_s1 + $0x4c0] ss:$8 sps:$4 sm:$0xff]   ;;  %v2449_v3 = vld [vmem:[%s3669_s1 + $0x4d4] ss:$8 sps:$4 sm:$0xff]  }
  0x16   :  { %1864 = vmatpush1.bf16.msra.mxu0 %v2398_v20  ;;  %1701 = vmatprep.subr.bf16.mxu1 %v2399_v21  ;;  %v304_v55 = vrot.slane %v25_v53, %v2954_v50  ;;  %v353_v61 = vrot.slane %v26_v57, %v2954_v50  ;;  %v2451_v5 = vld [vmem:[%s3669_s1 + $0xd0] ss:$8 sps:$4 sm:$0xff]   ;;  %v2453_v7 = vld [vmem:[%s3669_s1 + $0xe4] ss:$8 sps:$4 sm:$0xff]   ;;  %v2457_v9 = vld [vmem:[%s3669_s1 + $0xe0] ss:$8 sps:$4 sm:$0xff]   ;;  %v311_v19 = vrot.slane %v297_v13, %v2954_v50 }
  0x17   :  { %1865 = vmatprep.subr.bf16.mxu0 %v2401_v22  ;;  %v2452_v6 = vld [vmem:[%s3669_s1 + $0x4d0] ss:$8 sps:$4 sm:$0xff]   ;;  %v2455_v8 = vld [vmem:[%s3669_s1 + $0x4e4] ss:$8 sps:$4 sm:$0xff]   ;;  %v2458_v10 = vld [vmem:[%s3669_s1 + $0x4e0] ss:$8 sps:$4 sm:$0xff]   ;;  %v360_v20 = vrot.slane %v346_v14, %v2954_v50 }
  0x18   :  { %v312_v60 = vcombine.high %v304_v55, %v304_v55  ;;  %v361_v63 = vcombine.high %v353_v61, %v353_v61  ;;  %v2459_v11 = vld [vmem:[%s3669_s1 + $0xf4] ss:$8 sps:$4 sm:$0xff]   ;;  %v2463_v15 = vld [vmem:[%s3669_s1 + $0xf0] ss:$8 sps:$4 sm:$0xff]   ;;  %v2468_v17 = vld [vmem:[%s3669_s1 + $0x104] ss:$8 sps:$4 sm:$0xff]   ;;  %v3038_v21 = vrot.slane %v304_v55, %v2954_v50  ;;  %v3041_v22 = vrot.slane %v353_v61, %v2954_v50 }
  0x19   :  { %1702 = vmatpush1.bf16.msra.mxu1 %v2403_v23  ;;  %v2461_v12 = vld [vmem:[%s3669_s1 + $0x4f4] ss:$8 sps:$4 sm:$0xff]   ;;  %v2464_v16 = vld [vmem:[%s3669_s1 + $0x4f0] ss:$8 sps:$4 sm:$0xff]   ;;  %v2472_v18 = vld [vmem:[%s3669_s1 + $0x504] ss:$8 sps:$4 sm:$0xff]   ;;  %v313_v23 = vcombine.high %v311_v19, %v311_v19 }
  0x1a   :  { %1866 = vmatpush1.bf16.msra.mxu0 %v2404_v24  ;;  %1703 = vmatprep.subr.bf16.mxu1 %v2405_v25  ;;  %v2983_v62 = vrot.slane %v312_v60, %v2954_v50  ;;  %v383_v4 = vrot.slane %v361_v63, %v2954_v50  ;;  %v362_v24 = vcombine.high %v360_v20, %v360_v20  ;;  %v2466_v25 = vld [vmem:[%s3669_s1 + $0x100] ss:$8 sps:$4 sm:$0xff]   ;;  %v2481_v37 = vld [vmem:[%s3669_s1 + $0x124] ss:$8 sps:$4 sm:$0xff]   ;;  %v2485_v44 = vld [vmem:[%s3669_s1 + $0x130] ss:$8 sps:$4 sm:$0xff]  }
  0x1b   :  { %1867 = vmatprep.subr.bf16.mxu0 %v2407_v26  ;;  %v2470_v26 = vld [vmem:[%s3669_s1 + $0x500] ss:$8 sps:$4 sm:$0xff]   ;;  %v2484_v38 = vld [vmem:[%s3669_s1 + $0x524] ss:$8 sps:$4 sm:$0xff]   ;;  %v2500_v53 = vld [vmem:[%s3669_s1 + $0x550] ss:$8 sps:$4 sm:$0xff]  }
  0x1c   :  { %1723 = vmatprep.mubr.bf16.mxu1 %v2983_v62  ;;  %1887 = vmatprep.mubr.bf16.mxu0 %v383_v4  ;;  %v2479_v39 = vld [vmem:[%s3669_s1 + $0x120] ss:$8 sps:$4 sm:$0xff]   ;;  %v2508_v55 = vld [vmem:[%s3669_s1 + $0x564] ss:$8 sps:$4 sm:$0xff]   ;;  %v2509_v60 = vld [vmem:[%s3669_s1 + $0x170] ss:$8 sps:$4 sm:$0xff]  }
  0x1d   :  { %1704 = vmatpush1.bf16.msra.mxu1 %v2409_v27  ;;  %v2475_v27 = vld [vmem:[%s3669_s1 + $0x114] ss:$8 sps:$4 sm:$0xff]   ;;  %v2506_v57 = vld [vmem:[%s3669_s1 + $0x560] ss:$8 sps:$4 sm:$0xff]   ;;  %v2512_v61 = vld [vmem:[%s3669_s1 + $0x570] ss:$8 sps:$4 sm:$0xff]  }
  0x1e   :  { %1868 = vmatpush1.bf16.msra.mxu0 %v2410_v28  ;;  %1705 = vmatprep.subr.bf16.mxu1 %v2411_v29  ;;  %v2478_v28 = vld [vmem:[%s3669_s1 + $0x514] ss:$8 sps:$4 sm:$0xff]   ;;  %v3056_v29 = vrot.slane %v313_v23, %v2954_v50  ;;  %v2520_v63 = vld [vmem:[%s3669_s1 + $0x584] ss:$8 sps:$4 sm:$0xff]   ;;  %v2536_v13 = vld [vmem:[%s3669_s1 + $0x5b0] ss:$8 sps:$4 sm:$0xff]  }
  0x1f   :  { %1869 = vmatprep.subr.bf16.mxu0 %v2413_v30  ;;  %v3059_v30 = vrot.slane %v362_v24, %v2954_v50  ;;  %v2541_v14 = vld [vmem:[%s3669_s1 + $0x1c4] ss:$8 sps:$4 sm:$0xff]   ;;  %v2548_v23 = vld [vmem:[%s3669_s1 + $0x5d0] ss:$8 sps:$4 sm:$0xff]  }
  0x20   :  { %v2553_v24 = vld [vmem:[%s3669_s1 + $0x1e4] ss:$8 sps:$4 sm:$0xff]  }
  0x21   :  { %1706 = vmatpush1.bf16.msra.mxu1 %v2415_v31  ;;  %v3062_v31 = vrot.slane %v311_v19, %v2954_v50  ;;  %v2550_v19 = vld [vmem:[%s3669_s1 + $0x5d4] ss:$8 sps:$4 sm:$0xff]  }
  0x22   :  { %1870 = vmatpush1.bf16.msra.mxu0 %v2416_v32  ;;  %1707 = vmatprep.subr.bf16.mxu1 %v2417_v33  ;;  %v344_v32 = vcombine.high %v2983_v62, %v2983_v62  ;;  %v393_v33 = vcombine.high %v383_v4, %v383_v4  ;;  %v2517_v62 = vld [vmem:[%s3669_s1 + $0x184] ss:$8 sps:$4 sm:$0xff]   ;;  %v2521_v4 = vld [vmem:[%s3669_s1 + $0x190] ss:$8 sps:$4 sm:$0xff]  }
  0x23   :  { %1871 = vmatprep.subr.bf16.mxu0 %v2419_v34  ;;  %v3067_v34 = vrot.slane %v360_v20, %v2954_v50  ;;  %v2499_v50 = vld [vmem:[%s3669_s1 + $0x154] ss:$8 sps:$4 sm:$0xff]   ;;  %v2545_v20 = vld [vmem:[%s3669_s1 + $0x1d0] ss:$8 sps:$4 sm:$0xff]  }
  0x25   :  { %1708 = vmatpush1.bf16.msra.mxu1 %v2421_v35  ;;  %v2473_v35 = vld [vmem:[%s3669_s1 + $0x110] ss:$8 sps:$4 sm:$0xff]  }
  0x26   :  { %1872 = vmatpush1.bf16.msra.mxu0 %v2422_v36  ;;  %1709 = vmatprep.subr.bf16.mxu1 %v2423_v40  ;;  %v2476_v36 = vld [vmem:[%s3669_s1 + $0x510] ss:$8 sps:$4 sm:$0xff]   ;;  %v2482_v40 = vld [vmem:[%s3669_s1 + $0x520] ss:$8 sps:$4 sm:$0xff]  }
  0x27   :  { %1873 = vmatprep.subr.bf16.mxu0 %v2425_v41  ;;  %v2487_v41 = vld [vmem:[%s3669_s1 + $0x134] ss:$8 sps:$4 sm:$0xff]  }
  0x29   :  { %1710 = vmatpush1.bf16.msra.mxu1 %v2427_v42  ;;  %v2490_v42 = vld [vmem:[%s3669_s1 + $0x534] ss:$8 sps:$4 sm:$0xff]  }
  0x2a   :  { %1874 = vmatpush1.bf16.msra.mxu0 %v2428_v45  ;;  %1711 = vmatprep.subr.bf16.mxu1 %v2429_v46  ;;  %v2488_v45 = vld [vmem:[%s3669_s1 + $0x530] ss:$8 sps:$4 sm:$0xff]   ;;  %v2493_v46 = vld [vmem:[%s3669_s1 + $0x144] ss:$8 sps:$4 sm:$0xff]  }
  0x2b   :  { %1875 = vmatprep.subr.bf16.mxu0 %v2431_v47  ;;  %v2496_v47 = vld [vmem:[%s3669_s1 + $0x544] ss:$8 sps:$4 sm:$0xff]  }
  0x2d   :  { %1712 = vmatpush1.bf16.msra.mxu1 %v2433_v48  ;;  %v2491_v48 = vld [vmem:[%s3669_s1 + $0x140] ss:$8 sps:$4 sm:$0xff]  }
  0x2e   :  { %1876 = vmatpush1.bf16.msra.mxu0 %v2434_v49  ;;  %1713 = vmatprep.subr.bf16.mxu1 %v2435_v51  ;;  %v2494_v49 = vld [vmem:[%s3669_s1 + $0x540] ss:$8 sps:$4 sm:$0xff]   ;;  %v2502_v51 = vld [vmem:[%s3669_s1 + $0x554] ss:$8 sps:$4 sm:$0xff]  }
  0x2f   :  { %1877 = vmatprep.subr.bf16.mxu0 %v2437_v52  ;;  %v2497_v52 = vld [vmem:[%s3669_s1 + $0x150] ss:$8 sps:$4 sm:$0xff]  }
  0x31   :  { %1714 = vmatpush1.bf16.msra.mxu1 %v2439_v54  ;;  %v2505_v54 = vld [vmem:[%s3669_s1 + $0x164] ss:$8 sps:$4 sm:$0xff]  }
  0x32   :  { %1878 = vmatpush1.bf16.msra.mxu0 %v2440_v56  ;;  %1715 = vmatprep.subr.bf16.mxu1 %v2441_v58  ;;  %v2503_v56 = vld [vmem:[%s3669_s1 + $0x160] ss:$8 sps:$4 sm:$0xff]   ;;  %v2511_v58 = vld [vmem:[%s3669_s1 + $0x174] ss:$8 sps:$4 sm:$0xff]  }
  0x33   :  { %1879 = vmatprep.subr.bf16.mxu0 %v2443_v59  ;;  %v2514_v59 = vld [vmem:[%s3669_s1 + $0x574] ss:$8 sps:$4 sm:$0xff]  }
  0x35   :  { %1716 = vmatpush1.bf16.msra.mxu1 %v2445_v0  ;;  %v2515_v0 = vld [vmem:[%s3669_s1 + $0x180] ss:$8 sps:$4 sm:$0xff]  }
  0x36   :  { %1880 = vmatpush1.bf16.msra.mxu0 %v2446_v1  ;;  %1717 = vmatprep.subr.bf16.mxu1 %v2447_v2  ;;  %v2518_v1 = vld [vmem:[%s3669_s1 + $0x580] ss:$8 sps:$4 sm:$0xff]   ;;  %v2523_v2 = vld [vmem:[%s3669_s1 + $0x194] ss:$8 sps:$4 sm:$0xff]  }
  0x37   :  { %1881 = vmatprep.subr.bf16.mxu0 %v2449_v3  ;;  %v2526_v3 = vld [vmem:[%s3669_s1 + $0x594] ss:$8 sps:$4 sm:$0xff]  }
  0x39   :  { %1718 = vmatpush1.bf16.msra.mxu1 %v2451_v5  ;;  %v2524_v5 = vld [vmem:[%s3669_s1 + $0x590] ss:$8 sps:$4 sm:$0xff]  }
  0x3a   :  { %1882 = vmatpush1.bf16.msra.mxu0 %v2452_v6  ;;  %1719 = vmatprep.subr.bf16.mxu1 %v2453_v7  ;;  %v2529_v6 = vld [vmem:[%s3669_s1 + $0x1a4] ss:$8 sps:$4 sm:$0xff]  }
  0x3b   :  { %1883 = vmatprep.subr.bf16.mxu0 %v2455_v8  ;;  %v2532_v7 = vld [vmem:[%s3669_s1 + $0x5a4] ss:$8 sps:$4 sm:$0xff]   ;;  %v2527_v8 = vld [vmem:[%s3669_s1 + $0x1a0] ss:$8 sps:$4 sm:$0xff]  }
  0x3d   :  { %1720 = vmatpush1.bf16.msra.mxu1 %v2457_v9  ;;  %v2530_v9 = vld [vmem:[%s3669_s1 + $0x5a0] ss:$8 sps:$4 sm:$0xff]  }
  0x3e   :  { %1884 = vmatpush1.bf16.msra.mxu0 %v2458_v10  ;;  %1721 = vmatprep.subr.bf16.mxu1 %v2459_v11  ;;  %v2535_v10 = vld [vmem:[%s3669_s1 + $0x1b4] ss:$8 sps:$4 sm:$0xff]  }
  0x3f   :  { %1885 = vmatprep.subr.bf16.mxu0 %v2461_v12  ;;  %v2538_v11 = vld [vmem:[%s3669_s1 + $0x5b4] ss:$8 sps:$4 sm:$0xff]   ;;  %v2533_v12 = vld [vmem:[%s3669_s1 + $0x1b0] ss:$8 sps:$4 sm:$0xff]  }
  0x41   :  { %1722 = vmatpush1.bf16.msra.mxu1 %v2463_v15  ;;  %v2544_v15 = vld [vmem:[%s3669_s1 + $0x5c4] ss:$8 sps:$4 sm:$0xff]  }
  0x42   :  { %1886 = vmatpush1.bf16.msra.mxu0 %v2464_v16  ;;  %1732 = vmatprep.subr.bf16.mxu1 %v2468_v17  ;;  %v2539_v16 = vld [vmem:[%s3669_s1 + $0x1c0] ss:$8 sps:$4 sm:$0xff]  }
  0x43   :  { %1896 = vmatprep.subr.bf16.mxu0 %v2472_v18  ;;  %v2542_v17 = vld [vmem:[%s3669_s1 + $0x5c0] ss:$8 sps:$4 sm:$0xff]   ;;  %v2547_v18 = vld [vmem:[%s3669_s1 + $0x1d4] ss:$8 sps:$4 sm:$0xff]  }
  0x44   :  { %1724 = vmatmul.mubr.bf16.vlgmr.msra.gmra.mrb[0].mxu1 %v3038_v21 }
  0x45   :  { %1888 = vmatmul.mubr.bf16.vlgmr.msra.gmra.mrb[0].mxu0 %v3041_v22  ;;  %1733 = vmatpush1.bf16.msra.mxu1 %v2466_v25  ;;  %v2556_v25 = vld [vmem:[%s3669_s1 + $0x5e4] ss:$8 sps:$4 sm:$0xff]  }
  0x46   :  { %1897 = vmatpush1.bf16.msra.mxu0 %v2470_v26  ;;  %1734 = vmatprep.subr.bf16.mxu1 %v2475_v27  ;;  %v2551_v26 = vld [vmem:[%s3669_s1 + $0x1e0] ss:$8 sps:$4 sm:$0xff]  }
  0x47   :  { %1898 = vmatprep.subr.bf16.mxu0 %v2478_v28  ;;  %1764 = vmatprep.mubr.bf16.mxu1 %v344_v32  ;;  %v2554_v27 = vld [vmem:[%s3669_s1 + $0x5e0] ss:$8 sps:$4 sm:$0xff]   ;;  %v2559_v28 = vld [vmem:[%s3669_s1 + $0x1f4] ss:$8 sps:$4 sm:$0xff]  }
  0x48   :  { %1928 = vmatprep.mubr.bf16.mxu0 %v393_v33  ;;  %v2562_v32 = vld [vmem:[%s3669_s1 + $0x5f4] ss:$8 sps:$4 sm:$0xff]   ;;  %v2557_v33 = vld [vmem:[%s3669_s1 + $0x1f0] ss:$8 sps:$4 sm:$0xff]  }
  0x49   :  { %1735 = vmatpush1.bf16.msra.mxu1 %v2473_v35  ;;  %v2560_v35 = vld [vmem:[%s3669_s1 + $0x5f0] ss:$8 sps:$4 sm:$0xff]  }
  0x4a   :  { %1899 = vmatpush1.bf16.msra.mxu0 %v2476_v36  ;;  %1736 = vmatprep.subr.bf16.mxu1 %v2481_v37  ;;  %v2565_v36 = vld [vmem:[%s3669_s1 + $0x204] ss:$8 sps:$4 sm:$0xff]  }
  0x4b   :  { %1900 = vmatprep.subr.bf16.mxu0 %v2484_v38  ;;  %v2568_v37 = vld [vmem:[%s3669_s1 + $0x604] ss:$8 sps:$4 sm:$0xff]   ;;  %v342_v38 = vcombine.high %v3038_v21, %v3038_v21  ;;  %v2574_v21 = vld [vmem:[%s3669_s1 + $0x614] ss:$8 sps:$4 sm:$0xff]  }
  0x4d   :  { %1737 = vmatpush1.bf16.msra.mxu1 %v2479_v39  ;;  %v391_v39 = vcombine.high %v3041_v22, %v3041_v22  ;;  %v2569_v22 = vld [vmem:[%s3669_s1 + $0x210] ss:$8 sps:$4 sm:$0xff]  }
  0x4e   :  { %1901 = vmatpush1.bf16.msra.mxu0 %v2482_v40  ;;  %1738 = vmatprep.subr.bf16.mxu1 %v2487_v41  ;;  %v2563_v40 = vld [vmem:[%s3669_s1 + $0x200] ss:$8 sps:$4 sm:$0xff]  }
  0x4f   :  { %1902 = vmatprep.subr.bf16.mxu0 %v2490_v42  ;;  %v2566_v41 = vld [vmem:[%s3669_s1 + $0x600] ss:$8 sps:$4 sm:$0xff]   ;;  %v2571_v42 = vld [vmem:[%s3669_s1 + $0x214] ss:$8 sps:$4 sm:$0xff]  }
  0x51   :  { %1739 = vmatpush1.bf16.msra.mxu1 %v2485_v44  ;;  %v2572_v44 = vld [vmem:[%s3669_s1 + $0x610] ss:$8 sps:$4 sm:$0xff]  }
  0x52   :  { %1903 = vmatpush1.bf16.msra.mxu0 %v2488_v45  ;;  %1740 = vmatprep.subr.bf16.mxu1 %v2493_v46  ;;  %v2577_v45 = vld [vmem:[%s3669_s1 + $0x224] ss:$8 sps:$4 sm:$0xff]  }
  0x53   :  { %1904 = vmatprep.subr.bf16.mxu0 %v2496_v47  ;;  %v2580_v46 = vld [vmem:[%s3669_s1 + $0x624] ss:$8 sps:$4 sm:$0xff]   ;;  %v2575_v47 = vld [vmem:[%s3669_s1 + $0x220] ss:$8 sps:$4 sm:$0xff]  }
  0x55   :  { %1741 = vmatpush1.bf16.msra.mxu1 %v2491_v48  ;;  %v2578_v48 = vld [vmem:[%s3669_s1 + $0x620] ss:$8 sps:$4 sm:$0xff]  }
  0x56   :  { %1905 = vmatpush1.bf16.msra.mxu0 %v2494_v49  ;;  %1742 = vmatprep.subr.bf16.mxu1 %v2499_v50  ;;  %v2583_v49 = vld [vmem:[%s3669_s1 + $0x234] ss:$8 sps:$4 sm:$0xff]  }
  0x57   :  { %1906 = vmatprep.subr.bf16.mxu0 %v2502_v51  ;;  %v2586_v50 = vld [vmem:[%s3669_s1 + $0x634] ss:$8 sps:$4 sm:$0xff]   ;;  %v2581_v51 = vld [vmem:[%s3669_s1 + $0x230] ss:$8 sps:$4 sm:$0xff]  }
  0x59   :  { %1743 = vmatpush1.bf16.msra.mxu1 %v2497_v52  ;;  %v2584_v52 = vld [vmem:[%s3669_s1 + $0x630] ss:$8 sps:$4 sm:$0xff]  }
  0x5a   :  { %1907 = vmatpush1.bf16.msra.mxu0 %v2500_v53  ;;  %1744 = vmatprep.subr.bf16.mxu1 %v2505_v54  ;;  %v2589_v53 = vld [vmem:[%s3669_s1 + $0x244] ss:$8 sps:$4 sm:$0xff]  }
  0x5b   :  { %1908 = vmatprep.subr.bf16.mxu0 %v2508_v55  ;;  %v2592_v54 = vld [vmem:[%s3669_s1 + $0x644] ss:$8 sps:$4 sm:$0xff]   ;;  %v2587_v55 = vld [vmem:[%s3669_s1 + $0x240] ss:$8 sps:$4 sm:$0xff]  }
  0x5d   :  { %1745 = vmatpush1.bf16.msra.mxu1 %v2503_v56  ;;  %v2590_v56 = vld [vmem:[%s3669_s1 + $0x640] ss:$8 sps:$4 sm:$0xff]  }
  0x5e   :  { %1909 = vmatpush1.bf16.msra.mxu0 %v2506_v57  ;;  %1746 = vmatprep.subr.bf16.mxu1 %v2511_v58  ;;  %v2595_v57 = vld [vmem:[%s3669_s1 + $0x254] ss:$8 sps:$4 sm:$0xff]  }
  0x5f   :  { %1910 = vmatprep.subr.bf16.mxu0 %v2514_v59  ;;  %v2598_v58 = vld [vmem:[%s3669_s1 + $0x654] ss:$8 sps:$4 sm:$0xff]   ;;  %v2593_v59 = vld [vmem:[%s3669_s1 + $0x250] ss:$8 sps:$4 sm:$0xff]  }
  0x61   :  { %1747 = vmatpush1.bf16.msra.mxu1 %v2509_v60  ;;  %v2596_v60 = vld [vmem:[%s3669_s1 + $0x650] ss:$8 sps:$4 sm:$0xff]  }
  0x62   :  { %1911 = vmatpush1.bf16.msra.mxu0 %v2512_v61  ;;  %1748 = vmatprep.subr.bf16.mxu1 %v2517_v62  ;;  %v2601_v61 = vld [vmem:[%s3669_s1 + $0x264] ss:$8 sps:$4 sm:$0xff]  }
  0x63   :  { %1912 = vmatprep.subr.bf16.mxu0 %v2520_v63  ;;  %v2604_v62 = vld [vmem:[%s3669_s1 + $0x664] ss:$8 sps:$4 sm:$0xff]   ;;  %v2599_v63 = vld [vmem:[%s3669_s1 + $0x260] ss:$8 sps:$4 sm:$0xff]  }
  0x65   :  { %1749 = vmatpush1.bf16.msra.mxu1 %v2515_v0  ;;  %v2602_v0 = vld [vmem:[%s3669_s1 + $0x660] ss:$8 sps:$4 sm:$0xff]  }
  0x66   :  { %1913 = vmatpush1.bf16.msra.mxu0 %v2518_v1  ;;  %1750 = vmatprep.subr.bf16.mxu1 %v2523_v2  ;;  %v2607_v1 = vld [vmem:[%s3669_s1 + $0x274] ss:$8 sps:$4 sm:$0xff]  }
  0x67   :  { %1914 = vmatprep.subr.bf16.mxu0 %v2526_v3  ;;  %v2610_v2 = vld [vmem:[%s3669_s1 + $0x674] ss:$8 sps:$4 sm:$0xff]   ;;  %v2605_v3 = vld [vmem:[%s3669_s1 + $0x270] ss:$8 sps:$4 sm:$0xff]  }
  0x69   :  { %1751 = vmatpush1.bf16.msra.mxu1 %v2521_v4  ;;  %v2608_v4 = vld [vmem:[%s3669_s1 + $0x670] ss:$8 sps:$4 sm:$0xff]  }
  0x6a   :  { %1915 = vmatpush1.bf16.msra.mxu0 %v2524_v5  ;;  %1752 = vmatprep.subr.bf16.mxu1 %v2529_v6  ;;  %v2613_v5 = vld [vmem:[%s3669_s1 + $0x284] ss:$8 sps:$4 sm:$0xff]  }
  0x6b   :  { %1916 = vmatprep.subr.bf16.mxu0 %v2532_v7  ;;  %v2616_v6 = vld [vmem:[%s3669_s1 + $0x684] ss:$8 sps:$4 sm:$0xff]   ;;  %v2611_v7 = vld [vmem:[%s3669_s1 + $0x280] ss:$8 sps:$4 sm:$0xff]  }
  0x6d   :  { %1753 = vmatpush1.bf16.msra.mxu1 %v2527_v8  ;;  %v2614_v8 = vld [vmem:[%s3669_s1 + $0x680] ss:$8 sps:$4 sm:$0xff]  }
  0x6e   :  { %1917 = vmatpush1.bf16.msra.mxu0 %v2530_v9  ;;  %1754 = vmatprep.subr.bf16.mxu1 %v2535_v10  ;;  %v2619_v9 = vld [vmem:[%s3669_s1 + $0x294] ss:$8 sps:$4 sm:$0xff]  }
  0x6f   :  { %1918 = vmatprep.subr.bf16.mxu0 %v2538_v11  ;;  %v2622_v10 = vld [vmem:[%s3669_s1 + $0x694] ss:$8 sps:$4 sm:$0xff]   ;;  %v2617_v11 = vld [vmem:[%s3669_s1 + $0x290] ss:$8 sps:$4 sm:$0xff]  }
  0x71   :  { %1755 = vmatpush1.bf16.msra.mxu1 %v2533_v12  ;;  %v2620_v12 = vld [vmem:[%s3669_s1 + $0x690] ss:$8 sps:$4 sm:$0xff]  }
  0x72   :  { %1919 = vmatpush1.bf16.msra.mxu0 %v2536_v13  ;;  %1756 = vmatprep.subr.bf16.mxu1 %v2541_v14  ;;  %v2625_v13 = vld [vmem:[%s3669_s1 + $0x2a4] ss:$8 sps:$4 sm:$0xff]  }
  0x73   :  { %1920 = vmatprep.subr.bf16.mxu0 %v2544_v15  ;;  %v2628_v14 = vld [vmem:[%s3669_s1 + $0x6a4] ss:$8 sps:$4 sm:$0xff]   ;;  %v2623_v15 = vld [vmem:[%s3669_s1 + $0x2a0] ss:$8 sps:$4 sm:$0xff]  }
  0x75   :  { %1757 = vmatpush1.bf16.msra.mxu1 %v2539_v16  ;;  %v2626_v16 = vld [vmem:[%s3669_s1 + $0x6a0] ss:$8 sps:$4 sm:$0xff]  }
  0x76   :  { %1921 = vmatpush1.bf16.msra.mxu0 %v2542_v17  ;;  %1758 = vmatprep.subr.bf16.mxu1 %v2547_v18  ;;  %v2631_v17 = vld [vmem:[%s3669_s1 + $0x2b4] ss:$8 sps:$4 sm:$0xff]  }
  0x77   :  { %1922 = vmatprep.subr.bf16.mxu0 %v2550_v19  ;;  %v2634_v18 = vld [vmem:[%s3669_s1 + $0x6b4] ss:$8 sps:$4 sm:$0xff]  }
  0x79   :  { %1759 = vmatpush1.bf16.msra.mxu1 %v2545_v20 }
  0x7a   :  { %1923 = vmatpush1.bf16.msra.mxu0 %v2548_v23  ;;  %1760 = vmatprep.subr.bf16.mxu1 %v2553_v24 }
  0x7b   :  { %1924 = vmatprep.subr.bf16.mxu0 %v2556_v25 }
  0x7d   :  { %1761 = vmatpush1.bf16.msra.mxu1 %v2551_v26 }
  0x7e   :  { %1925 = vmatpush1.bf16.msra.mxu0 %v2554_v27  ;;  %1762 = vmatprep.subr.bf16.mxu1 %v2559_v28 }
  0x7f   :  { %1926 = vmatprep.subr.bf16.mxu0 %v2562_v32 }
  0x81   :  { %1763 = vmatpush1.bf16.msra.mxu1 %v2557_v33 }
  0x82   :  { %1927 = vmatpush1.bf16.msra.mxu0 %v2560_v35  ;;  %1773 = vmatprep.subr.bf16.mxu1 %v2565_v36 }
  0x83   :  { %1937 = vmatprep.subr.bf16.mxu0 %v2568_v37 }
  0x84   :  { %1765 = vmatmul.mubr.bf16.vlgmr.msra.gmra.mrb[0].mxu1 %v342_v38 }
  0x85   :  { %1929 = vmatmul.mubr.bf16.vlgmr.msra.gmra.mrb[0].mxu0 %v391_v39  ;;  %1774 = vmatpush1.bf16.msra.mxu1 %v2563_v40 }
  0x86   :  { %1938 = vmatpush1.bf16.msra.mxu0 %v2566_v41  ;;  %1775 = vmatprep.subr.bf16.mxu1 %v2571_v42 }
  0x87   :  { %1939 = vmatprep.subr.bf16.mxu0 %v2574_v21  ;;  %1805 = vmatprep.mubr.bf16.mxu1 %v3056_v29 }
  0x88   :  { %1969 = vmatprep.mubr.bf16.mxu0 %v3059_v30 }
  0x89   :  { %1776 = vmatpush1.bf16.msra.mxu1 %v2569_v22 }
  0x8a   :  { %1940 = vmatpush1.bf16.msra.mxu0 %v2572_v44  ;;  %1777 = vmatprep.subr.bf16.mxu1 %v2577_v45 }
  0x8b   :  { %1941 = vmatprep.subr.bf16.mxu0 %v2580_v46 }
  0x8d   :  { %1778 = vmatpush1.bf16.msra.mxu1 %v2575_v47 }
  0x8e   :  { %1942 = vmatpush1.bf16.msra.mxu0 %v2578_v48  ;;  %1779 = vmatprep.subr.bf16.mxu1 %v2583_v49 }
  0x8f   :  { %1943 = vmatprep.subr.bf16.mxu0 %v2586_v50 }
  0x91   :  { %1780 = vmatpush1.bf16.msra.mxu1 %v2581_v51 }
  0x92   :  { %1944 = vmatpush1.bf16.msra.mxu0 %v2584_v52  ;;  %1781 = vmatprep.subr.bf16.mxu1 %v2589_v53 }
  0x93   :  { %1945 = vmatprep.subr.bf16.mxu0 %v2592_v54 }
  0x95   :  { %1782 = vmatpush1.bf16.msra.mxu1 %v2587_v55 }
  0x96   :  { %1946 = vmatpush1.bf16.msra.mxu0 %v2590_v56  ;;  %1783 = vmatprep.subr.bf16.mxu1 %v2595_v57 }
  0x97   :  { %1947 = vmatprep.subr.bf16.mxu0 %v2598_v58 }
  0x99   :  { %1784 = vmatpush1.bf16.msra.mxu1 %v2593_v59 }
  0x9a   :  { %1948 = vmatpush1.bf16.msra.mxu0 %v2596_v60  ;;  %1785 = vmatprep.subr.bf16.mxu1 %v2601_v61 }
  0x9b   :  { %1949 = vmatprep.subr.bf16.mxu0 %v2604_v62 }
  0x9d   :  { %1786 = vmatpush1.bf16.msra.mxu1 %v2599_v63 }
  0x9e   :  { %1950 = vmatpush1.bf16.msra.mxu0 %v2602_v0  ;;  %1787 = vmatprep.subr.bf16.mxu1 %v2607_v1 }
  0x9f   :  { %1951 = vmatprep.subr.bf16.mxu0 %v2610_v2 }
  0xa1   :  { %1788 = vmatpush1.bf16.msra.mxu1 %v2605_v3 }
  0xa2   :  { %1952 = vmatpush1.bf16.msra.mxu0 %v2608_v4  ;;  %1789 = vmatprep.subr.bf16.mxu1 %v2613_v5 }
  0xa3   :  { %1953 = vmatprep.subr.bf16.mxu0 %v2616_v6 }
  0xa5   :  { %1790 = vmatpush1.bf16.msra.mxu1 %v2611_v7 }
  0xa6   :  { %1954 = vmatpush1.bf16.msra.mxu0 %v2614_v8  ;;  %1791 = vmatprep.subr.bf16.mxu1 %v2619_v9 }
  0xa7   :  { %1955 = vmatprep.subr.bf16.mxu0 %v2622_v10 }
  0xa9   :  { %1792 = vmatpush1.bf16.msra.mxu1 %v2617_v11 }
  0xaa   :  { %1956 = vmatpush1.bf16.msra.mxu0 %v2620_v12  ;;  %1793 = vmatprep.subr.bf16.mxu1 %v2625_v13 }
  0xab   :  { %1957 = vmatprep.subr.bf16.mxu0 %v2628_v14 }
  0xac   :  { %14 = vsyncpa [#allocation4], 0  ;;  %v2629_v19 = vld [vmem:[%s3669_s1 + $0x2b0] ss:$8 sps:$4 sm:$0xff]   ;;  %v2637_v23 = vld [vmem:[%s3669_s1 + $0x2c4] ss:$8 sps:$4 sm:$0xff]   ;;  %v345_v48 = vcombine.high %v3056_v29, %v3056_v29  ;;  %v394_v49 = vcombine.high %v3059_v30, %v3059_v30 }
  0xad   :  { %1794 = vmatpush1.bf16.msra.mxu1 %v2623_v15  ;;  %v2632_v20 = vld [vmem:[%s3669_s1 + $0x6b0] ss:$8 sps:$4 sm:$0xff]   ;;  %v2640_v24 = vld [vmem:[%s3669_s1 + $0x6c4] ss:$8 sps:$4 sm:$0xff]   ;;  %v2635_v25 = vld [vmem:[%s3669_s1 + $0x2c0] ss:$8 sps:$4 sm:$0xff]  }
  0xae   :  { %1958 = vmatpush1.bf16.msra.mxu0 %v2626_v16  ;;  %1795 = vmatprep.subr.bf16.mxu1 %v2631_v17  ;;  %v2638_v26 = vld [vmem:[%s3669_s1 + $0x6c0] ss:$8 sps:$4 sm:$0xff]   ;;  %v2643_v27 = vld [vmem:[%s3669_s1 + $0x2d4] ss:$8 sps:$4 sm:$0xff]   ;;  %v2641_v32 = vld [vmem:[%s3669_s1 + $0x2d0] ss:$8 sps:$4 sm:$0xff]  }
  0xaf   :  { %1959 = vmatprep.subr.bf16.mxu0 %v2634_v18  ;;  %v2646_v28 = vld [vmem:[%s3669_s1 + $0x6d4] ss:$8 sps:$4 sm:$0xff]   ;;  %v2644_v33 = vld [vmem:[%s3669_s1 + $0x6d0] ss:$8 sps:$4 sm:$0xff]   ;;  %v2649_v35 = vld [vmem:[%s3669_s1 + $0x2e4] ss:$8 sps:$4 sm:$0xff]  }
  0xb0   :  { %v2652_v36 = vld [vmem:[%s3669_s1 + $0x6e4] ss:$8 sps:$4 sm:$0xff]   ;;  %v2647_v37 = vld [vmem:[%s3669_s1 + $0x2e0] ss:$8 sps:$4 sm:$0xff]   ;;  %v2655_v39 = vld [vmem:[%s3669_s1 + $0x2f4] ss:$8 sps:$4 sm:$0xff]  }
  0xb1   :  { %1796 = vmatpush1.bf16.msra.mxu1 %v2629_v19  ;;  %v2650_v38 = vld [vmem:[%s3669_s1 + $0x6e0] ss:$8 sps:$4 sm:$0xff]   ;;  %v2658_v40 = vld [vmem:[%s3669_s1 + $0x6f4] ss:$8 sps:$4 sm:$0xff]   ;;  %v2653_v41 = vld [vmem:[%s3669_s1 + $0x2f0] ss:$8 sps:$4 sm:$0xff]  }
  0xb2   :  { %1960 = vmatpush1.bf16.msra.mxu0 %v2632_v20  ;;  %1797 = vmatprep.subr.bf16.mxu1 %v2637_v23  ;;  %v2656_v42 = vld [vmem:[%s3669_s1 + $0x6f0] ss:$8 sps:$4 sm:$0xff]   ;;  %v2661_v21 = vld [vmem:[%s3669_s1 + $0x304] ss:$8 sps:$4 sm:$0xff]   ;;  %v2659_v44 = vld [vmem:[%s3669_s1 + $0x300] ss:$8 sps:$4 sm:$0xff]  }
  0xb3   :  { %1961 = vmatprep.subr.bf16.mxu0 %v2640_v24  ;;  %v2664_v22 = vld [vmem:[%s3669_s1 + $0x704] ss:$8 sps:$4 sm:$0xff]   ;;  %v2662_v45 = vld [vmem:[%s3669_s1 + $0x700] ss:$8 sps:$4 sm:$0xff]   ;;  %v2667_v46 = vld [vmem:[%s3669_s1 + $0x314] ss:$8 sps:$4 sm:$0xff]  }
  0xb4   :  { %v2670_v47 = vld [vmem:[%s3669_s1 + $0x714] ss:$8 sps:$4 sm:$0xff]   ;;  %v2665_v50 = vld [vmem:[%s3669_s1 + $0x310] ss:$8 sps:$4 sm:$0xff]   ;;  %v2673_v29 = vld [vmem:[%s3669_s1 + $0x324] ss:$8 sps:$4 sm:$0xff]  }
  0xb5   :  { %1798 = vmatpush1.bf16.msra.mxu1 %v2635_v25  ;;  %v2668_v51 = vld [vmem:[%s3669_s1 + $0x710] ss:$8 sps:$4 sm:$0xff]   ;;  %v2676_v30 = vld [vmem:[%s3669_s1 + $0x724] ss:$8 sps:$4 sm:$0xff]   ;;  %v2671_v52 = vld [vmem:[%s3669_s1 + $0x320] ss:$8 sps:$4 sm:$0xff]  }
  0xb6   :  { %1962 = vmatpush1.bf16.msra.mxu0 %v2638_v26  ;;  %1799 = vmatprep.subr.bf16.mxu1 %v2643_v27  ;;  %v2674_v53 = vld [vmem:[%s3669_s1 + $0x720] ss:$8 sps:$4 sm:$0xff]   ;;  %v2679_v54 = vld [vmem:[%s3669_s1 + $0x334] ss:$8 sps:$4 sm:$0xff]   ;;  %v2677_v56 = vld [vmem:[%s3669_s1 + $0x330] ss:$8 sps:$4 sm:$0xff]  }
  0xb7   :  { %1963 = vmatprep.subr.bf16.mxu0 %v2646_v28  ;;  %v2682_v55 = vld [vmem:[%s3669_s1 + $0x734] ss:$8 sps:$4 sm:$0xff]   ;;  %v2680_v57 = vld [vmem:[%s3669_s1 + $0x730] ss:$8 sps:$4 sm:$0xff]   ;;  %v2685_v58 = vld [vmem:[%s3669_s1 + $0x344] ss:$8 sps:$4 sm:$0xff]  }
  0xb8   :  { %v2688_v59 = vld [vmem:[%s3669_s1 + $0x744] ss:$8 sps:$4 sm:$0xff]   ;;  %v2683_v60 = vld [vmem:[%s3669_s1 + $0x340] ss:$8 sps:$4 sm:$0xff]   ;;  %v2691_v62 = vld [vmem:[%s3669_s1 + $0x354] ss:$8 sps:$4 sm:$0xff]  }
  0xb9   :  { %1800 = vmatpush1.bf16.msra.mxu1 %v2641_v32  ;;  %v2686_v61 = vld [vmem:[%s3669_s1 + $0x740] ss:$8 sps:$4 sm:$0xff]   ;;  %v2694_v63 = vld [vmem:[%s3669_s1 + $0x754] ss:$8 sps:$4 sm:$0xff]   ;;  %v2689_v0 = vld [vmem:[%s3669_s1 + $0x350] ss:$8 sps:$4 sm:$0xff]  }
  0xba   :  { %1964 = vmatpush1.bf16.msra.mxu0 %v2644_v33  ;;  %1801 = vmatprep.subr.bf16.mxu1 %v2649_v35  ;;  %v2692_v1 = vld [vmem:[%s3669_s1 + $0x750] ss:$8 sps:$4 sm:$0xff]   ;;  %v2697_v2 = vld [vmem:[%s3669_s1 + $0x364] ss:$8 sps:$4 sm:$0xff]   ;;  %v2695_v4 = vld [vmem:[%s3669_s1 + $0x360] ss:$8 sps:$4 sm:$0xff]  }
  0xbb   :  { %1965 = vmatprep.subr.bf16.mxu0 %v2652_v36  ;;  %v2700_v3 = vld [vmem:[%s3669_s1 + $0x764] ss:$8 sps:$4 sm:$0xff]   ;;  %v2698_v5 = vld [vmem:[%s3669_s1 + $0x760] ss:$8 sps:$4 sm:$0xff]   ;;  %v2703_v6 = vld [vmem:[%s3669_s1 + $0x374] ss:$8 sps:$4 sm:$0xff]  }
  0xbc   :  { %v2706_v7 = vld [vmem:[%s3669_s1 + $0x774] ss:$8 sps:$4 sm:$0xff]   ;;  %v2701_v8 = vld [vmem:[%s3669_s1 + $0x370] ss:$8 sps:$4 sm:$0xff]   ;;  %v2709_v10 = vld [vmem:[%s3669_s1 + $0x384] ss:$8 sps:$4 sm:$0xff]  }
  0xbd   :  { %1802 = vmatpush1.bf16.msra.mxu1 %v2647_v37  ;;  %v2704_v9 = vld [vmem:[%s3669_s1 + $0x770] ss:$8 sps:$4 sm:$0xff]   ;;  %v2712_v11 = vld [vmem:[%s3669_s1 + $0x784] ss:$8 sps:$4 sm:$0xff]   ;;  %v2707_v12 = vld [vmem:[%s3669_s1 + $0x380] ss:$8 sps:$4 sm:$0xff]  }
  0xbe   :  { %1966 = vmatpush1.bf16.msra.mxu0 %v2650_v38  ;;  %1803 = vmatprep.subr.bf16.mxu1 %v2655_v39  ;;  %v2710_v13 = vld [vmem:[%s3669_s1 + $0x780] ss:$8 sps:$4 sm:$0xff]   ;;  %v2715_v14 = vld [vmem:[%s3669_s1 + $0x394] ss:$8 sps:$4 sm:$0xff]   ;;  %v2713_v16 = vld [vmem:[%s3669_s1 + $0x390] ss:$8 sps:$4 sm:$0xff]  }
  0xbf   :  { %1967 = vmatprep.subr.bf16.mxu0 %v2658_v40  ;;  %v2718_v15 = vld [vmem:[%s3669_s1 + $0x794] ss:$8 sps:$4 sm:$0xff]   ;;  %v2716_v17 = vld [vmem:[%s3669_s1 + $0x790] ss:$8 sps:$4 sm:$0xff]   ;;  %v2721_v18 = vld [vmem:[%s3669_s1 + $0x3a4] ss:$8 sps:$4 sm:$0xff]  }
  0xc0   :  { %v2724_v19 = vld [vmem:[%s3669_s1 + $0x7a4] ss:$8 sps:$4 sm:$0xff]   ;;  %v2719_v20 = vld [vmem:[%s3669_s1 + $0x3a0] ss:$8 sps:$4 sm:$0xff]   ;;  %v2727_v24 = vld [vmem:[%s3669_s1 + $0x3b4] ss:$8 sps:$4 sm:$0xff]  }
  0xc1   :  { %1804 = vmatpush1.bf16.msra.mxu1 %v2653_v41  ;;  %v2722_v23 = vld [vmem:[%s3669_s1 + $0x7a0] ss:$8 sps:$4 sm:$0xff]   ;;  %v2730_v25 = vld [vmem:[%s3669_s1 + $0x7b4] ss:$8 sps:$4 sm:$0xff]   ;;  %v2725_v26 = vld [vmem:[%s3669_s1 + $0x3b0] ss:$8 sps:$4 sm:$0xff]  }
  0xc2   :  { %1968 = vmatpush1.bf16.msra.mxu0 %v2656_v42  ;;  %1814 = vmatprep.subr.bf16.mxu1 %v2661_v21  ;;  %v2728_v27 = vld [vmem:[%s3669_s1 + $0x7b0] ss:$8 sps:$4 sm:$0xff]   ;;  %v2733_v28 = vld [vmem:[%s3669_s1 + $0x3c4] ss:$8 sps:$4 sm:$0xff]   ;;  %v2731_v33 = vld [vmem:[%s3669_s1 + $0x3c0] ss:$8 sps:$4 sm:$0xff]  }
  0xc3   :  { %1978 = vmatprep.subr.bf16.mxu0 %v2664_v22  ;;  %v2736_v32 = vld [vmem:[%s3669_s1 + $0x7c4] ss:$8 sps:$4 sm:$0xff]   ;;  %v2734_v35 = vld [vmem:[%s3669_s1 + $0x7c0] ss:$8 sps:$4 sm:$0xff]   ;;  %v2739_v36 = vld [vmem:[%s3669_s1 + $0x3d4] ss:$8 sps:$4 sm:$0xff]  }
  0xc4   :  { %1806 = vmatmul.mubr.bf16.vlgmr.msra.gmra.mrb[0].mxu1 %v3062_v31  ;;  %v2742_v37 = vld [vmem:[%s3669_s1 + $0x7d4] ss:$8 sps:$4 sm:$0xff]   ;;  %v2737_v38 = vld [vmem:[%s3669_s1 + $0x3d0] ss:$8 sps:$4 sm:$0xff]   ;;  %v2745_v40 = vld [vmem:[%s3669_s1 + $0x3e4] ss:$8 sps:$4 sm:$0xff]  }
  0xc5   :  { %1970 = vmatmul.mubr.bf16.vlgmr.msra.gmra.mrb[0].mxu0 %v3067_v34  ;;  %1815 = vmatpush1.bf16.msra.mxu1 %v2659_v44  ;;  %v2740_v39 = vld [vmem:[%s3669_s1 + $0x7d0] ss:$8 sps:$4 sm:$0xff]   ;;  %v2748_v41 = vld [vmem:[%s3669_s1 + $0x7e4] ss:$8 sps:$4 sm:$0xff]   ;;  %v2743_v42 = vld [vmem:[%s3669_s1 + $0x3e0] ss:$8 sps:$4 sm:$0xff]  }
  0xc6   :  { %1979 = vmatpush1.bf16.msra.mxu0 %v2662_v45  ;;  %1816 = vmatprep.subr.bf16.mxu1 %v2667_v46  ;;  %v2746_v21 = vld [vmem:[%s3669_s1 + $0x7e0] ss:$8 sps:$4 sm:$0xff]   ;;  %v2751_v22 = vld [vmem:[%s3669_s1 + $0x3f4] ss:$8 sps:$4 sm:$0xff]   ;;  %v2749_v45 = vld [vmem:[%s3669_s1 + $0x3f0] ss:$8 sps:$4 sm:$0xff]  }
  0xc7   :  { %1980 = vmatprep.subr.bf16.mxu0 %v2670_v47  ;;  %1846 = vmatprep.mubr.bf16.mxu1 %v345_v48  ;;  %v2754_v44 = vld [vmem:[%s3669_s1 + $0x7f4] ss:$8 sps:$4 sm:$0xff]   ;;  %v2752_v46 = vld [vmem:[%s3669_s1 + $0x7f0] ss:$8 sps:$4 sm:$0xff]   ;;  %v343_v47 = vcombine.high %v3062_v31, %v3062_v31  ;;  %v392_v48 = vcombine.high %v3067_v34, %v3067_v34  ;;  %v2033_v31 = vld [vmem:[%s3671_s3] sm:$0x3] }
  0xc8   :  { %2010 = vmatprep.mubr.bf16.mxu0 %v394_v49  ;;  %v287_v49 = vsub.s32 0, %v2936_v43  ;;  %vm2047_vm0 = vcmask 1041408  }
  0xc9   :  { %1817 = vmatpush1.bf16.msra.mxu1 %v2665_v50  ;;  %v283_v50 = vld [vmem:[%s3670_s2] sm:$0x3]  ;;  %s2780_s2 = smov [#allocation3]  }
  0xca   :  { %1981 = vmatpush1.bf16.msra.mxu0 %v2668_v51  ;;  %1818 = vmatprep.subr.bf16.mxu1 %v2673_v29  ;;  %v291_v51 = vsub.s32 1, %v2936_v43  ;;  %v288_v29 = vrot.slane %v283_v50, %v287_v49  ;;  %s2069_s3 = sshll.u32 %s2780_s2, 4  ;;  %s2070_s3 = int_to_ptr.vmem [resolvable:$true] %s2069_s3 }
  0xcb   :  { %1982 = vmatprep.subr.bf16.mxu0 %v2676_v30  ;;  %s2755_s26 = scalar_lea.vmem %s2070_s3, 64  ;;  %p2760_p1 = scmp.lt.s32.totalorder %s2070_s3, %s2070_s3 }
  0xcc   :  { %v292_v30 = vrot.slane %v283_v50, %v291_v51  ;;  %v2042_v43 = vrot.slane %v2033_v31, %v291_v51  ;;  %p2756_p0 = scmp.ne.s32.totalorder %s2070_s3, %s2755_s26  ;;  %p2761_p2 = scmp.lt.s32.totalorder %s2755_s26, %s2755_s26 }
  0xcd   :  { %1819 = vmatpush1.bf16.msra.mxu1 %v2671_v52 }
  0xce   :  { %1983 = vmatpush1.bf16.msra.mxu0 %v2674_v53  ;;  %1820 = vmatprep.subr.bf16.mxu1 %v2679_v54  ;;  %p2762_p3 = por %p2761_p2, %p2760_p1 }
  0xcf   :  { %1984 = vmatprep.subr.bf16.mxu0 %v2682_v55 }
  0xd0   :  { %p2763_p4 = pnand %p2762_p3, %p2756_p0 }
  0xd1   :  { %1821 = vmatpush1.bf16.msra.mxu1 %v2677_v56 }
  0xd2   :  { %1985 = vmatpush1.bf16.msra.mxu0 %v2680_v57  ;;  %1822 = vmatprep.subr.bf16.mxu1 %v2685_v58 }
  0xd3   :  { %1986 = vmatprep.subr.bf16.mxu0 %v2688_v59 }
  0xd5   :  { %1823 = vmatpush1.bf16.msra.mxu1 %v2683_v60 }
  0xd6   :  { %1987 = vmatpush1.bf16.msra.mxu0 %v2686_v61  ;;  %1824 = vmatprep.subr.bf16.mxu1 %v2691_v62  ;;  %v2038_v62 = vrot.slane %v2033_v31, %v287_v49 }
  0xd7   :  { %1988 = vmatprep.subr.bf16.mxu0 %v2694_v63 }
  0xd9   :  { %1825 = vmatpush1.bf16.msra.mxu1 %v2689_v0 }
  0xda   :  { %1989 = vmatpush1.bf16.msra.mxu0 %v2692_v1  ;;  %1826 = vmatprep.subr.bf16.mxu1 %v2697_v2 }
  0xdb   :  { %1990 = vmatprep.subr.bf16.mxu0 %v2700_v3 }
  0xdd   :  { %1827 = vmatpush1.bf16.msra.mxu1 %v2695_v4 }
  0xde   :  { %1991 = vmatpush1.bf16.msra.mxu0 %v2698_v5  ;;  %1828 = vmatprep.subr.bf16.mxu1 %v2703_v6 }
  0xdf   :  { %1992 = vmatprep.subr.bf16.mxu0 %v2706_v7 }
  0xe1   :  { %1829 = vmatpush1.bf16.msra.mxu1 %v2701_v8 }
  0xe2   :  { %1993 = vmatpush1.bf16.msra.mxu0 %v2704_v9  ;;  %1830 = vmatprep.subr.bf16.mxu1 %v2709_v10 }
  0xe3   :  { %1994 = vmatprep.subr.bf16.mxu0 %v2712_v11 }
  0xe5   :  { %1831 = vmatpush1.bf16.msra.mxu1 %v2707_v12 }
  0xe6   :  { %1995 = vmatpush1.bf16.msra.mxu0 %v2710_v13  ;;  %1832 = vmatprep.subr.bf16.mxu1 %v2715_v14 }
  0xe7   :  { %1996 = vmatprep.subr.bf16.mxu0 %v2718_v15 }
  0xe9   :  { %1833 = vmatpush1.bf16.msra.mxu1 %v2713_v16 }
  0xea   :  { %1997 = vmatpush1.bf16.msra.mxu0 %v2716_v17  ;;  %1834 = vmatprep.subr.bf16.mxu1 %v2721_v18 }
  0xeb   :  { %1998 = vmatprep.subr.bf16.mxu0 %v2724_v19 }
  0xed   :  { %1835 = vmatpush1.bf16.msra.mxu1 %v2719_v20 }
  0xee   :  { %1999 = vmatpush1.bf16.msra.mxu0 %v2722_v23  ;;  %1836 = vmatprep.subr.bf16.mxu1 %v2727_v24 }
  0xef   :  { %2000 = vmatprep.subr.bf16.mxu0 %v2730_v25 }
  0xf1   :  { %1837 = vmatpush1.bf16.msra.mxu1 %v2725_v26 }
  0xf2   :  { %2001 = vmatpush1.bf16.msra.mxu0 %v2728_v27  ;;  %1838 = vmatprep.subr.bf16.mxu1 %v2733_v28 }
  0xf3   :  { %2002 = vmatprep.subr.bf16.mxu0 %v2736_v32 }
  0xf5   :  { %1839 = vmatpush1.bf16.msra.mxu1 %v2731_v33 }
  0xf6   :  { %2003 = vmatpush1.bf16.msra.mxu0 %v2734_v35  ;;  %1840 = vmatprep.subr.bf16.mxu1 %v2739_v36 }
  0xf7   :  { %2004 = vmatprep.subr.bf16.mxu0 %v2742_v37 }
  0xf9   :  { %1841 = vmatpush1.bf16.msra.mxu1 %v2737_v38 }
  0xfa   :  { %2005 = vmatpush1.bf16.msra.mxu0 %v2740_v39  ;;  %1842 = vmatprep.subr.bf16.mxu1 %v2745_v40 }
  0xfb   :  { %2006 = vmatprep.subr.bf16.mxu0 %v2748_v41 }
  0xfd   :  { %1843 = vmatpush1.bf16.msra.mxu1 %v2743_v42 }
  0xfe   :  { %2007 = vmatpush1.bf16.msra.mxu0 %v2746_v21  ;;  %1844 = vmatprep.subr.bf16.mxu1 %v2751_v22 }
  0xff   :  { %2008 = vmatprep.subr.bf16.mxu0 %v2754_v44 }
 0x101   :  { %1845 = vmatpush1.bf16.msra.mxu1 %v2749_v45 }
 0x102   :  { %2009 = vmatpush1.bf16.msra.mxu0 %v2752_v46 }
 0x104   :  { %1847 = vmatmul.mubr.bf16.vlgmr.msra.gmra.mrb[0].mxu1 %v343_v47 }
 0x105   :  { %2011 = vmatmul.mubr.bf16.vlgmr.msra.gmra.mrb[0].mxu0 %v392_v48 }
 0x1d7   :  { %v1848_v52 = vpop.f32.mrb[0].mxu1 }
 0x1d8   :  { %v2012_v53 = vpop.f32.mrb[0].mxu0  ;;  %v2339_v34 = vadd.f32 %v1848_v52, %v288_v29  ;;  %v1850_v54 = vpop.f32.mrb[1].mxu1 }
 0x1d9   :  { %v2014_v55 = vpop.f32.mrb[1].mxu0  ;;  %v2341_v56 = vadd.f32 %v1850_v54, %v292_v30  ;;  %v1852_v57 = vpop.f32.mrb[2].mxu1 }
 0x1da   :  { %v2016_v58 = vpop.f32.mrb[2].mxu0  ;;  %v2340_v59 = vadd.f32 %v2339_v34, %v2012_v53  ;;  %v1853_v60 = vpop.f32.mrb[3].mxu1 }
 0x1db   :  { %v2017_v61 = vpop.f32.mrb[3].mxu0  ;;  %v2342_v63 = vadd.f32 %v2341_v56, %v2014_v55 }
 0x1dc   :  { %v2019_v0 = vmax.f32 %v2340_v59, 0.0 }
 0x1dd   :  { %v2020_v1 = vmax.f32 %v2342_v63, 0.0 }
 0x1de   :  { %v2045_v2 = vmul.f32 %v2038_v62, %v2019_v0 }
 0x1df   :  { %v2046_v3 = vmul.f32 %v2042_v43, %v2020_v1  ;;  %v2023_v4 = vcombine.low %v2019_v0, %v2020_v1 }
 0x1e0   :  { %v2048_v5 = vsel %vm2047_vm0, %v2045_v2, 0.0 }
 0x1e1   :  { %v2049_v6 = vsel %vm2047_vm0, %v2046_v3, 0.0  ;;  %2337 = vst.sshfl [vmem:[#allocation3] sm:$0x33 pattern:$0x76325410] %v2023_v4 }
 0x1e2   :  { %v2050_v7 = vadd.f32 %v2049_v6, %v2048_v5 }
 0x1e4   :  { %2051 = vadd.xlane.f32.xlu0 %v2050_v7 }
 0x1e5   :  { %2766 = shalt.err (!%p2763_p4)
}
 0x1e6   :  { %s2767_s28 = scalar_lea.hbm %s3673_s5, 64 }
 0x1e7   :  { %p2768_p5 = scmp.ne.s32.totalorder %s3673_s5, %s2767_s28  ;;  %p2771_p6 = scmp.lt.u32.totalorder %s2767_s28, %s3673_s5 }
 0x1e9   :  { %p2773_p7 = pnand %p2771_p6, %p2768_p5 }
 0x1eb   :  { %2776 = shalt.err (!%p2773_p7)
}
 0x1ec   :  { %2072 = dma.vmem_to_hbm [thread:$0]  %s2070_s3, 64, %s3673_s5, [#allocation4]   ;;  %v2338_v8 = vld [vmem:[#allocation2] ss:$0 sm:$0xff]  ;;  %vm2061_vm1 = vcmask 1024  }
 0x271   :  { %v2052_v9 = vpop.xlane.xlu0 %2051 }
 0x272   :  { %v2060_v10 = vadd.f32 %v2338_v8, %v2052_v9 }
 0x274   :  { %2062 = vst.msk [vmem:[%s3674_s6] sm:$0x3] %vm2061_vm1, %v2060_v10 }
 0x275   :  { %2777 = dma.done.wait [#allocation4], 64  }
 0x276   :  { %2778 = vsyncadd [#allocation4], 4294967232 }
 0x277   :  { %2080 = vsyncpa [#allocation4], 1 }

</bundles_post_ra>
